<compile_context>
chip_gen: v5e
topology: v5e:2x2
jax: 0.10.0
libtpu: 0.0.40
codegen_flags: <defaults>
</compile_context>

<pallas_src>
import functools
import math

import jax
import jax.numpy as jnp
from jax.experimental import pallas as pl
from jax.experimental.pallas import tpu as pltpu

_LANE = 128
_BATCH_ALIGN = 16          # bf16-friendly sublane multiple


def _round_up(x, m):
    return (x + m - 1) // m * m


def _choose_batch_tiling(batch, max_tile=256, align=_BATCH_ALIGN):
    """Pick (padded_batch, tile, n_tiles) so the grid is balanced across 2 TCs."""
    b_pad = _round_up(max(batch, 1), align)
    n_tiles = -(-b_pad // max_tile)          # cdiv
    if n_tiles > 1 and n_tiles % 2 == 1:
        n_tiles += 1                          # even grid -> balanced on v7x megacore
    tile = _round_up(-(-b_pad // n_tiles), align)
    b_pad = tile * n_tiles
    return b_pad, tile, n_tiles


def _fused_mlp_kernel(*refs, n_layers):
    """refs = (x_ref, w1t_ref, b1_ref, ..., wNt_ref, bN_ref, o_ref).

    x_ref:  (B_TILE, IN_PAD) bf16 tile of the (padded) batch.
    wKt:    (in_k, out_k)    bf16, pre-transposed weights (VMEM-resident).
    bK:     (1, out_k)       f32 bias row.
    o_ref:  (B_TILE, OUT_PAD) f32 lane-dense logits tile.
    """
    x_ref = refs[0]
    o_ref = refs[-1]
    wb = refs[1:-1]

    h = x_ref[...]                                        # bf16 activations
    for li in range(n_layers):
        wt = wb[2 * li][...]                              # (in, out) bf16
        b = wb[2 * li + 1][...]                           # (1, out)  f32
        z = jnp.dot(h, wt, preferred_element_type=jnp.float32) + b
        if li < n_layers - 1:
            z = jnp.maximum(z, 0.0)                       # f32 elementwise (VPU)
            h = z.astype(jnp.bfloat16)                    # back to bf16 for the MXU
        else:
            o_ref[...] = z.astype(o_ref.dtype)


def fused_mlp_forward(x2d, packed_params, *, n_classes, in_pad, max_b_tile=256):
    """x2d: (B, input_size) f32; packed_params: [(wt_bf16, b_f32_row), ...]."""
    B, in_size = x2d.shape
    n_layers = len(packed_params)

    b_pad, b_tile, n_tiles = _choose_batch_tiling(B, max_b_tile)

    # Pad batch + feature dims, then cast to bf16 (halves the dominant input
    # DMA stream; padded zeros contribute nothing to the matmul).
    x2d = jnp.pad(x2d, ((0, b_pad - B), (0, in_pad - in_size)))
    x_bf16 = x2d.astype(jnp.bfloat16)

    out_pad = packed_params[-1][0].shape[1]   # lane-padded logits width

    flat_wb = []
    in_specs = [pl.BlockSpec((b_tile, in_pad), lambda i: (i, 0))]
    for wt, b in packed_params:
        flat_wb.extend([wt, b])
        # Full-array, grid-invariant blocks: fetched once, VMEM-resident.
        in_specs.append(pl.BlockSpec(wt.shape, lambda i: (0, 0)))
        in_specs.append(pl.BlockSpec(b.shape, lambda i: (0, 0)))

    # Advisory cost hint for the XLA scheduler.
    flops = 2 * b_pad * sum(wt.shape[0] * wt.shape[1] for wt, _ in packed_params)
    bytes_accessed = (
        b_pad * in_pad * 2                                       # bf16 input
        + sum(wt.size * 2 + b.size * 4 for wt, b in packed_params)
        + b_pad * out_pad * 4)                                   # f32 output
    cost = pl.CostEstimate(flops=flops, transcendentals=0,
                           bytes_accessed=bytes_accessed)

    kernel = functools.partial(_fused_mlp_kernel, n_layers=n_layers)
    out = pl.pallas_call(
        kernel,
        out_shape=jax.ShapeDtypeStruct((b_pad, out_pad), jnp.float32),
        grid=(n_tiles,),
        in_specs=in_specs,
        out_specs=pl.BlockSpec((b_tile, out_pad), lambda i: (i, 0)),
        compiler_params=pltpu.CompilerParams(
            dimension_semantics=("parallel",)),
        cost_estimate=cost,
    )(x_bf16, *flat_wb)

    return out[:B, :n_classes]


class MLPPallas:
    """Mirrors MLP(input_size, hidden_sizes, n_classes, bias=True, dropout=False)."""

    def __init__(self, input_size=784, hidden_sizes=(512, 256), n_classes=10,
                 key=jax.random.PRNGKey(0), max_b_tile=256):
        self.input_size = input_size
        self.n_classes = n_classes
        self.max_b_tile = max_b_tile
        self.in_pad = _round_up(input_size, _LANE)   # 784 -> 896, lane-dense K

        fan_ins = [input_size] + list(hidden_sizes)
        fan_outs = list(hidden_sizes) + [n_classes]
        self.params = []   # PyTorch convention: W (out, in), b (out,), f32
        for fan_in, fan_out in zip(fan_ins, fan_outs):
            key, wk, bk = jax.random.split(key, 3)
            bound = 1.0 / math.sqrt(fan_in)
            w = jax.random.uniform(wk, (fan_out, fan_in), jnp.float32,
                                   minval=-bound, maxval=bound)
            b = jax.random.uniform(bk, (fan_out,), jnp.float32,
                                   minval=-bound, maxval=bound)
            self.params.append((w, b))

        # Pack once at init: transpose to (in, out), cast weights to bf16,
        # biases to (1, out) f32. Zero-pad layer-0 K rows to in_pad and
        # lane-pad the final layer's output dim to a multiple of 128.
        self.packed = []
        n = len(self.params)
        for li, (w, b) in enumerate(self.params):
            wt = w.T.astype(jnp.bfloat16)
            b2 = b.reshape(1, -1).astype(jnp.float32)
            if li == 0 and self.in_pad != wt.shape[0]:
                wt = jnp.pad(wt, ((0, self.in_pad - wt.shape[0]), (0, 0)))
            if li == n - 1:
                out_pad = _round_up(wt.shape[1], _LANE)
                wt = jnp.pad(wt, ((0, 0), (0, out_pad - wt.shape[1])))
                b2 = jnp.pad(b2, ((0, 0), (0, out_pad - b2.shape[1])))
            self.packed.append((wt, b2))
        # TODO(synk): dropout (train-mode) not implemented; module default is dropout=False.

    def __call__(self, x):
        x2d = x.reshape(-1, self.input_size)          # x.view(-1, input_size)
        return fused_mlp_forward(x2d, self.packed, n_classes=self.n_classes,
                                 in_pad=self.in_pad, max_b_tile=self.max_b_tile)


def reference_forward(packed, x, input_size, in_pad, n_classes):
    """Pure-JAX reference mirroring the kernel's bf16 activation/weight path."""
    h = x.reshape(-1, input_size).astype(jnp.float32)
    h = jnp.pad(h, ((0, 0), (0, in_pad - input_size)))
    h = h.astype(jnp.bfloat16)
    n = len(packed)
    out = None
    for li, (wt, b) in enumerate(packed):
        z = jnp.dot(h.astype(jnp.float32), wt.astype(jnp.float32),
                    precision=jax.lax.Precision.HIGHEST) + b
        if li < n - 1:
            z = jnp.maximum(z, 0.0)
            h = z.astype(jnp.bfloat16)
        else:
            out = z
    return out[:, :n_classes]


if __name__ == "__main__":
    key = jax.random.PRNGKey(0)
    key, xkey, xkey2 = jax.random.split(key, 3)

    input_size = 784
    hidden_sizes = (512, 256)
    n_classes = 10

    model = MLPPallas(input_size=input_size, hidden_sizes=hidden_sizes,
                      n_classes=n_classes, key=key)

    # MNIST-like input (B, 1, 28, 28) -> flattened inside forward.
    x_small = jax.random.normal(xkey, (8, 1, 28, 28), jnp.float32)
    logits_small = jax.block_until_ready(model(x_small))
    ref_small = reference_forward(model.packed, x_small, input_size,
                                  model.in_pad, n_classes)
    assert logits_small.shape == (8, n_classes), logits_small.shape
    assert jnp.allclose(logits_small, ref_small, atol=1e-3, rtol=1e-3), \
        float(jnp.max(jnp.abs(logits_small - ref_small)))

    # Larger, non-multiple-of-tile batch: exercises multi-tile, balanced grid.
    x_big = jax.random.normal(xkey2, (300, 1, 28, 28), jnp.float32)
    logits_big = jax.block_until_ready(model(x_big))
    ref_big = reference_forward(model.packed, x_big, input_size,
                                model.in_pad, n_classes)
    assert logits_big.shape == (300, n_classes), logits_big.shape
    assert jnp.allclose(logits_big, ref_big, atol=1e-3, rtol=1e-3), \
        float(jnp.max(jnp.abs(logits_big - ref_big)))

    print("KERNEL_OK")
</pallas_src>

<mosaic_0001>
module attributes {stable_mosaic.version = 11 : i64} {
  func.func @_fused_mlp_kernel(%arg0: i32, %arg1: memref<16x896xbf16, #tpu.memory_space<vmem>>, %arg2: memref<896x512xbf16, #tpu.memory_space<vmem>>, %arg3: memref<1x512xf32, #tpu.memory_space<vmem>>, %arg4: memref<512x256xbf16, #tpu.memory_space<vmem>>, %arg5: memref<1x256xf32, #tpu.memory_space<vmem>>, %arg6: memref<256x128xbf16, #tpu.memory_space<vmem>>, %arg7: memref<1x128xf32, #tpu.memory_space<vmem>>, %arg8: memref<16x128xf32, #tpu.memory_space<vmem>>) attributes {dimension_semantics = [#tpu.dimension_semantics<parallel>], iteration_bounds = array<i64: 1>, scalar_prefetch = 0 : i64, scratch_operands = 0 : i64, tpu.core_type = #tpu.core_type<tc>, window_params = [{transform_indices = @transform_0, window_bounds = array<i64: 16, 896>}, {pipeline_mode = #tpu.pipeline_mode<synchronous>, transform_indices = @transform_1, window_bounds = array<i64: 896, 512>}, {pipeline_mode = #tpu.pipeline_mode<synchronous>, transform_indices = @transform_2, window_bounds = array<i64: 1, 512>}, {pipeline_mode = #tpu.pipeline_mode<synchronous>, transform_indices = @transform_3, window_bounds = array<i64: 512, 256>}, {pipeline_mode = #tpu.pipeline_mode<synchronous>, transform_indices = @transform_4, window_bounds = array<i64: 1, 256>}, {pipeline_mode = #tpu.pipeline_mode<synchronous>, transform_indices = @transform_5, window_bounds = array<i64: 256, 128>}, {pipeline_mode = #tpu.pipeline_mode<synchronous>, transform_indices = @transform_6, window_bounds = array<i64: 1, 128>}, {transform_indices = @transform_7, window_bounds = array<i64: 16, 128>}]} {
    %c0 = arith.constant 0 : index
    %c0_0 = arith.constant 0 : index
    %0 = vector.load %arg1[%c0, %c0_0] : memref<16x896xbf16, #tpu.memory_space<vmem>>, vector<16x896xbf16>
    %c0_1 = arith.constant 0 : index
    %c0_2 = arith.constant 0 : index
    %1 = vector.load %arg2[%c0_1, %c0_2] : memref<896x512xbf16, #tpu.memory_space<vmem>>, vector<896x512xbf16>
    %c0_3 = arith.constant 0 : index
    %c0_4 = arith.constant 0 : index
    %2 = vector.load %arg3[%c0_3, %c0_4] : memref<1x512xf32, #tpu.memory_space<vmem>>, vector<1x512xf32>
    %cst = arith.constant dense<0.000000e+00> : vector<16x512xf32>
    %3 = tpu.matmul %0, %1, %cst {dimension_numbers = #tpu.dot_dimension_numbers<[1], [0], [0], [1], [0, 0, 1, 1], [], []>} : vector<16x896xbf16>, vector<896x512xbf16>, vector<16x512xf32> -> vector<16x512xf32>
    %4 = vector.broadcast %2 : vector<1x512xf32> to vector<16x512xf32>
    %5 = arith.addf %3, %4 : vector<16x512xf32>
    %cst_5 = arith.constant 0.000000e+00 : f32
    %6 = vector.broadcast %cst_5 : f32 to vector<16x512xf32>
    %7 = arith.maximumf %5, %6 : vector<16x512xf32>
    %8 = arith.truncf %7 : vector<16x512xf32> to vector<16x512xbf16>
    %c0_6 = arith.constant 0 : index
    %c0_7 = arith.constant 0 : index
    %9 = vector.load %arg4[%c0_6, %c0_7] : memref<512x256xbf16, #tpu.memory_space<vmem>>, vector<512x256xbf16>
    %c0_8 = arith.constant 0 : index
    %c0_9 = arith.constant 0 : index
    %10 = vector.load %arg5[%c0_8, %c0_9] : memref<1x256xf32, #tpu.memory_space<vmem>>, vector<1x256xf32>
    %cst_10 = arith.constant dense<0.000000e+00> : vector<16x256xf32>
    %11 = tpu.matmul %8, %9, %cst_10 {dimension_numbers = #tpu.dot_dimension_numbers<[1], [0], [0], [1], [0, 0, 1, 1], [], []>} : vector<16x512xbf16>, vector<512x256xbf16>, vector<16x256xf32> -> vector<16x256xf32>
    %12 = vector.broadcast %10 : vector<1x256xf32> to vector<16x256xf32>
    %13 = arith.addf %11, %12 : vector<16x256xf32>
    %cst_11 = arith.constant 0.000000e+00 : f32
    %14 = vector.broadcast %cst_11 : f32 to vector<16x256xf32>
    %15 = arith.maximumf %13, %14 : vector<16x256xf32>
    %16 = arith.truncf %15 : vector<16x256xf32> to vector<16x256xbf16>
    %c0_12 = arith.constant 0 : index
    %c0_13 = arith.constant 0 : index
    %17 = vector.load %arg6[%c0_12, %c0_13] : memref<256x128xbf16, #tpu.memory_space<vmem>>, vector<256x128xbf16>
    %c0_14 = arith.constant 0 : index
    %c0_15 = arith.constant 0 : index
    %18 = vector.load %arg7[%c0_14, %c0_15] : memref<1x128xf32, #tpu.memory_space<vmem>>, vector<1x128xf32>
    %cst_16 = arith.constant dense<0.000000e+00> : vector<16x128xf32>
    %19 = tpu.matmul %16, %17, %cst_16 {dimension_numbers = #tpu.dot_dimension_numbers<[1], [0], [0], [1], [0, 0, 1, 1], [], []>} : vector<16x256xbf16>, vector<256x128xbf16>, vector<16x128xf32> -> vector<16x128xf32>
    %20 = vector.broadcast %18 : vector<1x128xf32> to vector<16x128xf32>
    %21 = arith.addf %19, %20 : vector<16x128xf32>
    %c0_17 = arith.constant 0 : index
    %c0_18 = arith.constant 0 : index
    %22 = vector.load %arg8[%c0_17, %c0_18] : memref<16x128xf32, #tpu.memory_space<vmem>>, vector<16x128xf32>
    tpu.vector_store %arg8[%c0_17, %c0_18], %21 {strides = array<i32>} : memref<16x128xf32, #tpu.memory_space<vmem>>, vector<16x128xf32>,
    return
  }
  func.func @transform_0(%arg0: i32) -> (i32, i32) {
    %c0_i32 = arith.constant 0 : i32
    %c0_i32_0 = arith.constant 0 : i32
    return %arg0, %c0_i32 : i32, i32
  }
  func.func @transform_1(%arg0: i32) -> (i32, i32) {
    %c0_i32 = arith.constant 0 : i32
    %c0_i32_0 = arith.constant 0 : i32
    %c0_i32_1 = arith.constant 0 : i32
    return %c0_i32, %c0_i32_0 : i32, i32
  }
  func.func @transform_2(%arg0: i32) -> (i32, i32) {
    %c0_i32 = arith.constant 0 : i32
    %c0_i32_0 = arith.constant 0 : i32
    %c0_i32_1 = arith.constant 0 : i32
    return %c0_i32, %c0_i32_0 : i32, i32
  }
  func.func @transform_3(%arg0: i32) -> (i32, i32) {
    %c0_i32 = arith.constant 0 : i32
    %c0_i32_0 = arith.constant 0 : i32
    %c0_i32_1 = arith.constant 0 : i32
    return %c0_i32, %c0_i32_0 : i32, i32
  }
  func.func @transform_4(%arg0: i32) -> (i32, i32) {
    %c0_i32 = arith.constant 0 : i32
    %c0_i32_0 = arith.constant 0 : i32
    %c0_i32_1 = arith.constant 0 : i32
    return %c0_i32, %c0_i32_0 : i32, i32
  }
  func.func @transform_5(%arg0: i32) -> (i32, i32) {
    %c0_i32 = arith.constant 0 : i32
    %c0_i32_0 = arith.constant 0 : i32
    %c0_i32_1 = arith.constant 0 : i32
    return %c0_i32, %c0_i32_0 : i32, i32
  }
  func.func @transform_6(%arg0: i32) -> (i32, i32) {
    %c0_i32 = arith.constant 0 : i32
    %c0_i32_0 = arith.constant 0 : i32
    %c0_i32_1 = arith.constant 0 : i32
    return %c0_i32, %c0_i32_0 : i32, i32
  }
  func.func @transform_7(%arg0: i32) -> (i32, i32) {
    %c0_i32 = arith.constant 0 : i32
    %c0_i32_0 = arith.constant 0 : i32
    return %arg0, %c0_i32 : i32, i32
  }
}

</mosaic_0001>

<bundles_post_ra>
// kernel: tpu_custom_call.1
= control target key start
LH: loop header
LB: loop body
LE: loop exit
PB: predicated region body
PF: predicated region fallthrough
CT: control target
= control target key end

     0   :  { %12 = vsyncpa [#allocation3], 0  ;;  %s4466_s0 = inlined_call_operand.hbm [shape: bf16[16,896], index: 0, kind: input, shape index: {}]   ;;  %s4467_s1 = inlined_call_operand.hbm [shape: bf16[896,512], index: 1, kind: input, shape index: {}]   ;;  %s4468_s2 = inlined_call_operand.hbm [shape: f32[1,512], index: 2, kind: input, shape index: {}]   ;;  %s4469_s3 = inlined_call_operand.hbm [shape: bf16[512,256], index: 3, kind: input, shape index: {}]   ;;  %s4470_s4 = inlined_call_operand.vmem [shape: f32[1,256], index: 4, kind: input, shape index: {}]   ;;  %s4471_s5 = inlined_call_operand.hbm [shape: bf16[256,128], index: 5, kind: input, shape index: {}]   ;;  %s4472_s6 = inlined_call_operand.vmem [shape: f32[1,128], index: 6, kind: input, shape index: {}]   ;;  %s4473_s7 = inlined_call_operand.hbm [shape: f32[16,128], index: 7, kind: output, shape index: {}]  }
   0x1   :  { %13 = vsyncpa [#allocation6], 0 }
   0x2   :  { %14 = vsyncpa [#allocation9], 0  ;;  %s33_s26 = sshll.u32 %s4467_s1, 4  ;;  %s34_s26 = int_to_ptr.hbm [resolvable:$true] %s33_s26 }
   0x3   :  { %15 = vsyncpa [#allocation4], 0  ;;  %s4318_s27 = smov [#allocation5]   ;;  %s57_s8 = sshll.u32 %s4469_s3, 4  ;;  %s58_s8 = int_to_ptr.hbm [resolvable:$true] %s57_s8 }
   0x4   :  { %s35_s28 = sshll.u32 %s4318_s27, 4  ;;  %s4319_s9 = smov 256   ;;  %s36_s28 = int_to_ptr.vmem [resolvable:$true] %s35_s28 }
   0x5   :  { %s4320_s10 = smov 16   ;;  %s4321_s11 = smov [#allocation8]  }
   0x6   :  { %41 = dma.hbm_to_vmem [thread:$0]  %s34_s26, 28672, %s36_s28, [#allocation6], %s4319_s9, %s4319_s9, %s4320_s10  }
   0x7   :  { %s59_s12 = sshll.u32 %s4321_s11, 4  ;;  %s4322_s13 = smov 128   ;;  %s60_s12 = int_to_ptr.vmem [resolvable:$true] %s59_s12 }
   0x8   :  { %s4323_s14 = smov 8   ;;  %s20_s16 = sshll.u32 %s4466_s0, 4  ;;  %s21_s16 = int_to_ptr.hbm [resolvable:$true] %s20_s16 }
   0x9   :  { %65 = dma.hbm_to_vmem [thread:$0]  %s58_s8, 8192, %s60_s12, [#allocation9], %s4322_s13, %s4322_s13, %s4323_s14  }
   0xa   :  { %s4324_s17 = smov [#allocation2]   ;;  %s47_s20 = sshll.u32 %s4468_s2, 4  ;;  %s48_s20 = int_to_ptr.hbm [resolvable:$true] %s47_s20 }
   0xb   :  { %s22_s3 = sshll.u32 %s4324_s17, 4  ;;  %s4325_s21 = smov 448   ;;  %s23_s3 = int_to_ptr.vmem [resolvable:$true] %s22_s3 }
   0xc   :  { %s4326_s22 = smov 28   ;;  %s4327_s23 = smov [#allocation7]  }
   0xd   :  { %28 = dma.hbm_to_vmem [thread:$0]  %s21_s16, 896, %s23_s3, [#allocation3], %s4325_s21, %s4325_s21, %s4326_s22  }
   0xe   :  { %s49_s24 = sshll.u32 %s4327_s23, 4  ;;  %s72_s27 = sshll.u32 %s4471_s5, 4  ;;  %s50_s24 = int_to_ptr.vmem [resolvable:$true] %s49_s24  ;;  %s73_s27 = int_to_ptr.hbm [resolvable:$true] %s72_s27 }
   0xf   :  { %52 = dma.hbm_to_vmem [thread:$0]  %s48_s20, 64, %s50_s24, [#allocation6]  }
  0x10   :  { %s4328_s0 = smov [#allocation10]   ;;  %s4329_s29 = smov 64  }
  0x11   :  { %s74_s28 = sshll.u32 %s4328_s0, 4  ;;  %s4330_s30 = smov 4   ;;  %s75_s28 = int_to_ptr.vmem [resolvable:$true] %s74_s28 }
  0x12   :  { %80 = dma.hbm_to_vmem [thread:$0]  %s73_s27, 2048, %s75_s28, [#allocation9], %s4329_s29, %s4329_s29, %s4330_s30  }
  0x13   :  { %4310 = dma.done.wait [#allocation3], 896  }
  0x14   :  { %4311 = vsyncadd [#allocation3], 4294966400 }
  0x15   :  { %4312 = dma.done.wait [#allocation6], 28736  }
  0x16   :  { %4313 = vsyncadd [#allocation6], 4294938560 }
  0x17   :  { %4314 = dma.done.wait [#allocation9], 10240  }
  0x18   :  { %4315 = vsyncadd [#allocation9], 4294957056  ;;  %v2738_v0 = vld [vmem:[#allocation5 + $0xe0] sm:$0xf]  ;;  %v3877_v1 = vld [vmem:[#allocation5 + $0xec] sm:$0xf0] }
  0x19   :  { %v2866_v2 = vld [vmem:[#allocation5 + $0x1e0] sm:$0xf]  ;;  %v2739_v3 = vor.u32 %v3877_v1, %v2738_v0  ;;  %v3909_v4 = vld [vmem:[#allocation5 + $0x1ec] sm:$0xf0]  ;;  %s4331_s9 = smov [#allocation11]   ;;  %s2581_s1 = sshll.u32 %s4473_s7, 4  ;;  %s2582_s1 = int_to_ptr.hbm [resolvable:$true] %s2581_s1 }
  0x1a   :  { %v2994_v5 = vld [vmem:[#allocation5 + $0x2e0] sm:$0xf]  ;;  %v3941_v6 = vld [vmem:[#allocation5 + $0x2ec] sm:$0xf0]  ;;  %v2867_v7 = vor.u32 %v3909_v4, %v2866_v2  ;;  %s2579_s10 = sshll.u32 %s4331_s9, 4  ;;  %s2580_s10 = int_to_ptr.vmem [resolvable:$true] %s2579_s10 }
  0x1b   :  { %v2995_v8 = vor.u32 %v3941_v6, %v2994_v5  ;;  %v3122_v9 = vld [vmem:[#allocation5 + $0x3e0] sm:$0xf]  ;;  %v3973_v10 = vld [vmem:[#allocation5 + $0x3ec] sm:$0xf0]  ;;  %1501 = vmatpush.bf16.msra.mxu0 %v2739_v3 }
  0x1c   :  { %v2722_v11 = vld [vmem:[#allocation5 + $0xc0] sm:$0xf]  ;;  %v3123_v12 = vor.u32 %v3973_v10, %v3122_v9  ;;  %v3873_v13 = vld [vmem:[#allocation5 + $0xcc] sm:$0xf0]  ;;  %1515 = vmatpush.bf16.msra.mxu1 %v2867_v7 }
  0x1d   :  { %v2850_v14 = vld [vmem:[#allocation5 + $0x1c0] sm:$0xf]  ;;  %v3905_v15 = vld [vmem:[#allocation5 + $0x1cc] sm:$0xf0]  ;;  %1529 = vmatpush.bf16.msra.mxu2 %v2995_v8  ;;  %v2723_v16 = vor.u32 %v3873_v13, %v2722_v11 }
  0x1e   :  { %v2851_v17 = vor.u32 %v3905_v15, %v2850_v14  ;;  %v2978_v18 = vld [vmem:[#allocation5 + $0x2c0] sm:$0xf]  ;;  %v3937_v19 = vld [vmem:[#allocation5 + $0x2cc] sm:$0xf0]  ;;  %1543 = vmatpush.bf16.msra.mxu3 %v3123_v12 }
  0x1f   :  { %v3106_v20 = vld [vmem:[#allocation5 + $0x3c0] sm:$0xf]  ;;  %v2979_v21 = vor.u32 %v3937_v19, %v2978_v18  ;;  %v3969_v22 = vld [vmem:[#allocation5 + $0x3cc] sm:$0xf0]  ;;  %1502 = vmatpush.bf16.msra.mxu0 %v2723_v16 }
  0x20   :  { %v2706_v23 = vld [vmem:[#allocation5 + $0xa0] sm:$0xf]  ;;  %v3869_v24 = vld [vmem:[#allocation5 + $0xac] sm:$0xf0]  ;;  %v3107_v25 = vor.u32 %v3969_v22, %v3106_v20  ;;  %1516 = vmatpush.bf16.msra.mxu1 %v2851_v17 }
  0x21   :  { %v2834_v26 = vld [vmem:[#allocation5 + $0x1a0] sm:$0xf]  ;;  %v3901_v27 = vld [vmem:[#allocation5 + $0x1ac] sm:$0xf0]  ;;  %v2707_v29 = vor.u32 %v3869_v24, %v2706_v23  ;;  %1530 = vmatpush.bf16.msra.mxu2 %v2979_v21 }
  0x22   :  { %v2962_v28 = vld [vmem:[#allocation5 + $0x2a0] sm:$0xf]  ;;  %v3933_v30 = vld [vmem:[#allocation5 + $0x2ac] sm:$0xf0]  ;;  %v2835_v33 = vor.u32 %v3901_v27, %v2834_v26  ;;  %1544 = vmatpush.bf16.msra.mxu3 %v3107_v25 }
  0x23   :  { %v3090_v31 = vld [vmem:[#allocation5 + $0x3a0] sm:$0xf]  ;;  %v3965_v32 = vld [vmem:[#allocation5 + $0x3ac] sm:$0xf0]  ;;  %v2963_v34 = vor.u32 %v3933_v30, %v2962_v28  ;;  %1503 = vmatpush.bf16.msra.mxu0 %v2707_v29 }
  0x24   :  { %v2690_v35 = vld [vmem:[#allocation5 + $0x80] sm:$0xf]  ;;  %v3865_v36 = vld [vmem:[#allocation5 + $0x8c] sm:$0xf0]  ;;  %v3091_v38 = vor.u32 %v3965_v32, %v3090_v31  ;;  %1517 = vmatpush.bf16.msra.mxu1 %v2835_v33 }
  0x25   :  { %v2818_v37 = vld [vmem:[#allocation5 + $0x180] sm:$0xf]  ;;  %v3897_v39 = vld [vmem:[#allocation5 + $0x18c] sm:$0xf0]  ;;  %v2691_v44 = vor.u32 %v3865_v36, %v2690_v35  ;;  %1531 = vmatpush.bf16.msra.mxu2 %v2963_v34 }
  0x26   :  { %v2946_v40 = vld [vmem:[#allocation5 + $0x280] sm:$0xf]  ;;  %v3929_v41 = vld [vmem:[#allocation5 + $0x28c] sm:$0xf0]  ;;  %v2819_v45 = vor.u32 %v3897_v39, %v2818_v37  ;;  %1545 = vmatpush.bf16.msra.mxu3 %v3091_v38  ;;  %v3875_v37 = vld [vmem:[#allocation5 + $0xe4] sm:$0xf] }
  0x27   :  { %v3074_v42 = vld [vmem:[#allocation5 + $0x380] sm:$0xf]  ;;  %v3961_v43 = vld [vmem:[#allocation5 + $0x38c] sm:$0xf0]  ;;  %v2947_v46 = vor.u32 %v3929_v41, %v2946_v40  ;;  %1504 = vmatpush.bf16.msra.mxu0 %v2691_v44  ;;  %v2740_v38 = vld [vmem:[#allocation5 + $0xf0] sm:$0xf0] }
  0x28   :  { %v2674_v47 = vld [vmem:[#allocation5 + $0x60] sm:$0xf]  ;;  %v3861_v48 = vld [vmem:[#allocation5 + $0x6c] sm:$0xf0]  ;;  %v3075_v50 = vor.u32 %v3961_v43, %v3074_v42  ;;  %1518 = vmatpush.bf16.msra.mxu1 %v2819_v45 }
  0x29   :  { %v2802_v49 = vld [vmem:[#allocation5 + $0x160] sm:$0xf]  ;;  %v3893_v51 = vld [vmem:[#allocation5 + $0x16c] sm:$0xf0]  ;;  %v2675_v56 = vor.u32 %v3861_v48, %v2674_v47  ;;  %1532 = vmatpush.bf16.msra.mxu2 %v2947_v46  ;;  %v2743_v48 = vor.u32 %v3875_v37, %v2740_v38 }
  0x2a   :  { %v2930_v52 = vld [vmem:[#allocation5 + $0x260] sm:$0xf]  ;;  %v3925_v53 = vld [vmem:[#allocation5 + $0x26c] sm:$0xf0]  ;;  %v2803_v57 = vor.u32 %v3893_v51, %v2802_v49  ;;  %1546 = vmatpush.bf16.msra.mxu3 %v3075_v50  ;;  %v3871_v50 = vld [vmem:[#allocation5 + $0xc4] sm:$0xf] }
  0x2b   :  { %v3058_v54 = vld [vmem:[#allocation5 + $0x360] sm:$0xf]  ;;  %v3957_v55 = vld [vmem:[#allocation5 + $0x36c] sm:$0xf0]  ;;  %v2931_v58 = vor.u32 %v3925_v53, %v2930_v52  ;;  %1505 = vmatpush.bf16.msra.mxu0 %v2675_v56  ;;  %v2724_v51 = vld [vmem:[#allocation5 + $0xd0] sm:$0xf0] }
  0x2c   :  { %v2658_v59 = vld [vmem:[#allocation5 + $0x40] sm:$0xf]  ;;  %v3857_v60 = vld [vmem:[#allocation5 + $0x4c] sm:$0xf0]  ;;  %v3059_v62 = vor.u32 %v3957_v55, %v3058_v54  ;;  %1519 = vmatpush.bf16.msra.mxu1 %v2803_v57  ;;  %v2598_v52 = vld [vmem:[#allocation2] sm:$0xf] }
  0x2d   :  { %v2786_v61 = vld [vmem:[#allocation5 + $0x140] sm:$0xf]  ;;  %v3889_v63 = vld [vmem:[#allocation5 + $0x14c] sm:$0xf0]  ;;  %v2659_v4 = vor.u32 %v3857_v60, %v2658_v59  ;;  %1533 = vmatpush.bf16.msra.mxu2 %v2931_v58  ;;  %v3843_v53 = vld [vmem:[#allocation2 + $0x18] sm:$0xf0] }
  0x2e   :  { %v2914_v0 = vld [vmem:[#allocation5 + $0x240] sm:$0xf]  ;;  %v3921_v1 = vld [vmem:[#allocation5 + $0x24c] sm:$0xf0]  ;;  %v2787_v5 = vor.u32 %v3889_v63, %v2786_v61  ;;  %1547 = vmatpush.bf16.msra.mxu3 %v3059_v62  ;;  %v4390_v57 = vor.u32 %v3843_v53, %v2598_v52  ;;  %v3844_v58 = vld [vmem:[#allocation2 + $0x20] sm:$0xf0] }
  0x2f   :  { %v3042_v2 = vld [vmem:[#allocation5 + $0x340] sm:$0xf]  ;;  %v3953_v3 = vld [vmem:[#allocation5 + $0x34c] sm:$0xf0]  ;;  %v2915_v6 = vor.u32 %v3921_v1, %v2914_v0  ;;  %1506 = vmatpush.bf16.msra.mxu0 %v2659_v4  ;;  %v2727_v1 = vor.u32 %v3871_v50, %v2724_v51  ;;  %v3867_v4 = vld [vmem:[#allocation5 + $0xa4] sm:$0xf] }
  0x30   :  { %v2642_v7 = vld [vmem:[#allocation5 + $0x20] sm:$0xf]  ;;  %v3853_v8 = vld [vmem:[#allocation5 + $0x2c] sm:$0xf0]  ;;  %v3043_v10 = vor.u32 %v3953_v3, %v3042_v2  ;;  %1520 = vmatpush.bf16.msra.mxu1 %v2787_v5  ;;  %v2708_v5 = vld [vmem:[#allocation5 + $0xb0] sm:$0xf0] }
  0x31   :  { %v2770_v9 = vld [vmem:[#allocation5 + $0x120] sm:$0xf]  ;;  %v3885_v11 = vld [vmem:[#allocation5 + $0x12c] sm:$0xf0]  ;;  %v2643_v16 = vor.u32 %v3853_v8, %v2642_v7  ;;  %1534 = vmatpush.bf16.msra.mxu2 %v2915_v6  ;;  %v3840_v6 = vld [vmem:[#allocation2 + $0x4] sm:$0xf] }
  0x32   :  { %v2898_v12 = vld [vmem:[#allocation5 + $0x220] sm:$0xf]  ;;  %v3917_v13 = vld [vmem:[#allocation5 + $0x22c] sm:$0xf0]  ;;  %v2771_v19 = vor.u32 %v3885_v11, %v2770_v9  ;;  %1548 = vmatpush.bf16.msra.mxu3 %v3043_v10  ;;  %v2600_v7 = vld [vmem:[#allocation2 + $0x1c] sm:$0xf0] }
  0x33   :  { %v3026_v14 = vld [vmem:[#allocation5 + $0x320] sm:$0xf]  ;;  %v3949_v15 = vld [vmem:[#allocation5 + $0x32c] sm:$0xf0]  ;;  %v2899_v20 = vor.u32 %v3917_v13, %v2898_v12  ;;  %1507 = vmatpush.bf16.msra.mxu0 %v2643_v16  ;;  %v4396_v11 = vor.u32 %v3840_v6, %v2600_v7  ;;  %v3847_v7 = vld [vmem:[#allocation5 + $0x4] sm:$0xf] }
  0x34   :  { %v2626_v17 = vld [vmem:[#allocation5] sm:$0xf]  ;;  %v3849_v18 = vld [vmem:[#allocation5 + $0xc] sm:$0xf0]  ;;  %v3027_v24 = vor.u32 %v3949_v15, %v3026_v14  ;;  %1521 = vmatpush.bf16.msra.mxu1 %v2771_v19  ;;  %v3841_v19 = vld [vmem:[#allocation2 + $0xc] sm:$0xf] }
  0x35   :  { %v2754_v21 = vld [vmem:[#allocation5 + $0x100] sm:$0xf]  ;;  %v3881_v22 = vld [vmem:[#allocation5 + $0x10c] sm:$0xf0]  ;;  %v2627_v31 = vor.u32 %v3849_v18, %v2626_v17  ;;  %1535 = vmatpush.bf16.msra.mxu2 %v2899_v20  ;;  %v2711_v17 = vor.u32 %v3867_v4, %v2708_v5 }
  0x36   :  { %v2882_v23 = vld [vmem:[#allocation5 + $0x200] sm:$0xf]  ;;  %v3913_v25 = vld [vmem:[#allocation5 + $0x20c] sm:$0xf0]  ;;  %v2755_v35 = vor.u32 %v3881_v22, %v2754_v21  ;;  %1549 = vmatpush.bf16.msra.mxu3 %v3027_v24  ;;  %v3863_v21 = vld [vmem:[#allocation5 + $0x84] sm:$0xf] }
  0x37   :  { %v3010_v26 = vld [vmem:[#allocation5 + $0x300] sm:$0xf]  ;;  %v3945_v27 = vld [vmem:[#allocation5 + $0x30c] sm:$0xf0]  ;;  %v2883_v36 = vor.u32 %v3913_v25, %v2882_v23  ;;  %1508 = vmatpush.bf16.msra.mxu0 %v2627_v31  ;;  %v2692_v22 = vld [vmem:[#allocation5 + $0x90] sm:$0xf0] }
  0x38   :  { %v3250_v28 = vld [vmem:[#allocation5 + $0x4e0] sm:$0xf]  ;;  %v4005_v29 = vld [vmem:[#allocation5 + $0x4ec] sm:$0xf0]  ;;  %v3011_v39 = vor.u32 %v3945_v27, %v3010_v26  ;;  %1522 = vmatpush.bf16.msra.mxu1 %v2755_v35  ;;  %v2676_v35 = vld [vmem:[#allocation5 + $0x70] sm:$0xf0] }
  0x39   :  { %v3378_v30 = vld [vmem:[#allocation5 + $0x5e0] sm:$0xf]  ;;  %v4037_v32 = vld [vmem:[#allocation5 + $0x5ec] sm:$0xf0]  ;;  %v3251_v40 = vor.u32 %v4005_v29, %v3250_v28  ;;  %1536 = vmatpush.bf16.msra.mxu2 %v2883_v36 }
  0x3a   :  { %v3506_v33 = vld [vmem:[#allocation5 + $0x6e0] sm:$0xf]  ;;  %v4069_v34 = vld [vmem:[#allocation5 + $0x6ec] sm:$0xf0]  ;;  %v3379_v43 = vor.u32 %v4037_v32, %v3378_v30  ;;  %1550 = vmatpush.bf16.msra.mxu3 %v3011_v39  ;;  %1509 = vmatmul.bf16.vlgmr.msra.gmra.mxu0 %v4390_v57  ;;  %v2695_v30 = vor.u32 %v3863_v21, %v2692_v22  ;;  %v2614_v22 = vld [vmem:[#allocation2 + $0x10] sm:$0xf] }
  0x3b   :  { %v3234_v41 = vld [vmem:[#allocation5 + $0x4c0] sm:$0xf]  ;;  %v4001_v42 = vld [vmem:[#allocation5 + $0x4cc] sm:$0xf0]  ;;  %v3507_v44 = vor.u32 %v4069_v34, %v3506_v33  ;;  %1557 = vmatpush.bf16.msrb.mxu0 %v3251_v40  ;;  %1523 = vmatmul.bf16.vlgmr.msra.gmra.mxu1 %v4396_v11  ;;  %v3859_v34 = vld [vmem:[#allocation5 + $0x64] sm:$0xf] }
  0x3c   :  { %v3362_v45 = vld [vmem:[#allocation5 + $0x5c0] sm:$0xf]  ;;  %v4033_v46 = vld [vmem:[#allocation5 + $0x5cc] sm:$0xf0]  ;;  %v3235_v55 = vor.u32 %v4001_v42, %v3234_v41  ;;  %1571 = vmatpush.bf16.msrb.mxu1 %v3379_v43  ;;  %v2679_v42 = vor.u32 %v3859_v34, %v2676_v35  ;;  %v2852_v34 = vld [vmem:[#allocation5 + $0x1d0] sm:$0xf0] }
  0x3d   :  { %v3490_v47 = vld [vmem:[#allocation5 + $0x6c0] sm:$0xf]  ;;  %v4065_v49 = vld [vmem:[#allocation5 + $0x6cc] sm:$0xf0]  ;;  %1585 = vmatpush.bf16.msrb.mxu2 %v3507_v44  ;;  %v3363_v59 = vor.u32 %v4033_v46, %v3362_v45  ;;  %v3855_v46 = vld [vmem:[#allocation5 + $0x44] sm:$0xf] }
  0x3e   :  { %v2606_v54 = vld [vmem:[#allocation2 + $0x8] sm:$0xf]  ;;  %v3218_v56 = vld [vmem:[#allocation5 + $0x4a0] sm:$0xf]  ;;  %v3491_v60 = vor.u32 %v4065_v49, %v3490_v47  ;;  %1599 = vmatpush.bf16.msrb.mxu3 %v2743_v48  ;;  %v2660_v47 = vld [vmem:[#allocation5 + $0x50] sm:$0xf0] }
  0x3f   :  { %v3997_v61 = vld [vmem:[#allocation5 + $0x4ac] sm:$0xf0]  ;;  %v3346_v62 = vld [vmem:[#allocation5 + $0x5a0] sm:$0xf]  ;;  %v4392_v0 = vor.u32 %v3844_v58, %v2606_v54  ;;  %1558 = vmatpush.bf16.msrb.mxu0 %v3235_v55  ;;  %v2663_v54 = vor.u32 %v3855_v46, %v2660_v47  ;;  %v3935_v35 = vld [vmem:[#allocation5 + $0x2c4] sm:$0xf] }
  0x40   :  { %v4029_v63 = vld [vmem:[#allocation5 + $0x5ac] sm:$0xf0]  ;;  %v3474_v2 = vld [vmem:[#allocation5 + $0x6a0] sm:$0xf]  ;;  %v3219_v8 = vor.u32 %v3997_v61, %v3218_v56  ;;  %1572 = vmatpush.bf16.msrb.mxu1 %v3363_v59  ;;  %v3851_v59 = vld [vmem:[#allocation5 + $0x24] sm:$0xf] }
  0x41   :  { %v4061_v3 = vld [vmem:[#allocation5 + $0x6ac] sm:$0xf0]  ;;  %1537 = vmatmul.bf16.vlgmr.msra.gmra.mxu2 %v4392_v0  ;;  %v3202_v9 = vld [vmem:[#allocation5 + $0x480] sm:$0xf]  ;;  %v3347_v12 = vor.u32 %v4029_v63, %v3346_v62 }
  0x42   :  { %v3993_v10 = vld [vmem:[#allocation5 + $0x48c] sm:$0xf0]  ;;  %1586 = vmatpush.bf16.msrb.mxu2 %v3491_v60  ;;  %v3475_v13 = vor.u32 %v4061_v3, %v3474_v2  ;;  %v3330_v14 = vld [vmem:[#allocation5 + $0x580] sm:$0xf]  ;;  %1600 = vmatpush.bf16.msrb.mxu3 %v2727_v1  ;;  %v2644_v60 = vld [vmem:[#allocation5 + $0x30] sm:$0xf0] }
  0x43   :  { %v4025_v15 = vld [vmem:[#allocation5 + $0x58c] sm:$0xf0]  ;;  %v3458_v16 = vld [vmem:[#allocation5 + $0x680] sm:$0xf]  ;;  %1559 = vmatpush.bf16.msrb.mxu0 %v3219_v8  ;;  %v3203_v24 = vor.u32 %v3993_v10, %v3202_v9  ;;  %v2647_v8 = vor.u32 %v3851_v59, %v2644_v60  ;;  %v2628_v9 = vld [vmem:[#allocation5 + $0x10] sm:$0xf0] }
  0x44   :  { %v4057_v18 = vld [vmem:[#allocation5 + $0x68c] sm:$0xf0]  ;;  %1573 = vmatpush.bf16.msrb.mxu1 %v3347_v12  ;;  %v3331_v25 = vor.u32 %v4025_v15, %v3330_v14  ;;  %v3186_v27 = vld [vmem:[#allocation5 + $0x460] sm:$0xf]  ;;  %v3907_v10 = vld [vmem:[#allocation5 + $0x1e4] sm:$0xf] }
  0x45   :  { %v2608_v20 = vld [vmem:[#allocation2 + $0x24] sm:$0xf0]  ;;  %v3459_v26 = vor.u32 %v4057_v18, %v3458_v16  ;;  %v3314_v29 = vld [vmem:[#allocation5 + $0x560] sm:$0xf]  ;;  %v2868_v12 = vld [vmem:[#allocation5 + $0x1f0] sm:$0xf0] }
  0x46   :  { %v4399_v23 = vor.u32 %v3841_v19, %v2608_v20  ;;  %1587 = vmatpush.bf16.msrb.mxu2 %v3475_v13  ;;  %v3989_v28 = vld [vmem:[#allocation5 + $0x46c] sm:$0xf0]  ;;  %1601 = vmatpush.bf16.msrb.mxu3 %v2711_v17  ;;  %v3442_v32 = vld [vmem:[#allocation5 + $0x660] sm:$0xf]  ;;  %v3939_v13 = vld [vmem:[#allocation5 + $0x2e4] sm:$0xf] }
  0x47   :  { %v4021_v31 = vld [vmem:[#allocation5 + $0x56c] sm:$0xf0]  ;;  %1560 = vmatpush.bf16.msrb.mxu0 %v3203_v24  ;;  %v3187_v36 = vor.u32 %v3989_v28, %v3186_v27  ;;  %v3170_v39 = vld [vmem:[#allocation5 + $0x440] sm:$0xf]  ;;  %v2996_v14 = vld [vmem:[#allocation5 + $0x2f0] sm:$0xf0]  ;;  %v2871_v27 = vor.u32 %v3907_v10, %v2868_v12 }
  0x48   :  { %v4053_v33 = vld [vmem:[#allocation5 + $0x66c] sm:$0xf0]  ;;  %1551 = vmatmul.bf16.vlgmr.msra.gmra.mxu3 %v4399_v23  ;;  %1574 = vmatpush.bf16.msrb.mxu1 %v3331_v25  ;;  %v3315_v37 = vor.u32 %v4021_v31, %v3314_v29  ;;  %v3298_v41 = vld [vmem:[#allocation5 + $0x540] sm:$0xf]  ;;  %v3971_v15 = vld [vmem:[#allocation5 + $0x3e4] sm:$0xf]  ;;  %v2999_v31 = vor.u32 %v3939_v13, %v2996_v14 }
  0x49   :  { %v3443_v38 = vor.u32 %v4053_v33, %v3442_v32  ;;  %v3985_v40 = vld [vmem:[#allocation5 + $0x44c] sm:$0xf0]  ;;  %v3426_v44 = vld [vmem:[#allocation5 + $0x640] sm:$0xf]  ;;  %v3124_v17 = vld [vmem:[#allocation5 + $0x3f0] sm:$0xf0] }
  0x4a   :  { %1588 = vmatpush.bf16.msrb.mxu2 %v3459_v26  ;;  %1602 = vmatpush.bf16.msrb.mxu3 %v2695_v30  ;;  %v4017_v43 = vld [vmem:[#allocation5 + $0x54c] sm:$0xf0]  ;;  %v3171_v48 = vor.u32 %v3985_v40, %v3170_v39  ;;  %v3154_v51 = vld [vmem:[#allocation5 + $0x420] sm:$0xf]  ;;  %v4003_v18 = vld [vmem:[#allocation5 + $0x4e4] sm:$0xf]  ;;  %v2631_v26 = vor.u32 %v3847_v7, %v2628_v9  ;;  %v3127_v32 = vor.u32 %v3971_v15, %v3124_v17 }
  0x4b   :  { %v4049_v45 = vld [vmem:[#allocation5 + $0x64c] sm:$0xf0]  ;;  %1561 = vmatpush.bf16.msrb.mxu0 %v3187_v36  ;;  %v3299_v49 = vor.u32 %v4017_v43, %v3298_v41  ;;  %v3282_v53 = vld [vmem:[#allocation5 + $0x520] sm:$0xf]  ;;  %v3252_v19 = vld [vmem:[#allocation5 + $0x4f0] sm:$0xf0] }
  0x4c   :  { %1575 = vmatpush.bf16.msrb.mxu1 %v3315_v37  ;;  %v3427_v50 = vor.u32 %v4049_v45, %v3426_v44  ;;  %v3981_v52 = vld [vmem:[#allocation5 + $0x42c] sm:$0xf0]  ;;  %v3410_v56 = vld [vmem:[#allocation5 + $0x620] sm:$0xf]  ;;  %v3845_v24 = vld [vmem:[#allocation2 + $0x28] sm:$0xf0]  ;;  %v3255_v36 = vor.u32 %v4003_v18, %v3252_v19 }
  0x4d   :  { %v4013_v55 = vld [vmem:[#allocation5 + $0x52c] sm:$0xf0]  ;;  %v3138_v61 = vld [vmem:[#allocation5 + $0x400] sm:$0xf]  ;;  %v3155_v62 = vor.u32 %v3981_v52, %v3154_v51  ;;  %v3846_v28 = vld [vmem:[#allocation2 + $0x30] sm:$0xf0]  ;;  %v4402_v37 = vor.u32 %v3845_v24, %v2614_v22 }
  0x4e   :  { %1589 = vmatpush.bf16.msrb.mxu2 %v3443_v38  ;;  %1603 = vmatpush.bf16.msrb.mxu3 %v2679_v42  ;;  %v4045_v58 = vld [vmem:[#allocation5 + $0x62c] sm:$0xf0]  ;;  %v3266_v1 = vld [vmem:[#allocation5 + $0x500] sm:$0xf]  ;;  %v3283_v3 = vor.u32 %v4013_v55, %v3282_v53  ;;  %v3842_v29 = vld [vmem:[#allocation2 + $0x14] sm:$0xf] }
  0x4f   :  { %1562 = vmatpush.bf16.msrb.mxu0 %v3171_v48  ;;  %v3977_v63 = vld [vmem:[#allocation5 + $0x40c] sm:$0xf0]  ;;  %v3411_v4 = vor.u32 %v4045_v58, %v3410_v56  ;;  %v3394_v5 = vld [vmem:[#allocation5 + $0x600] sm:$0xf]  ;;  %v2616_v30 = vld [vmem:[#allocation2 + $0x2c] sm:$0xf0] }
  0x50   :  { %v4009_v2 = vld [vmem:[#allocation5 + $0x50c] sm:$0xf0]  ;;  %1576 = vmatpush.bf16.msrb.mxu1 %v3299_v49  ;;  %v3139_v16 = vor.u32 %v3977_v63, %v3138_v61  ;;  %v2622_v25 = vld [vmem:[#allocation2 + $0x18] sm:$0xf]  ;;  %v3903_v33 = vld [vmem:[#allocation5 + $0x1c4] sm:$0xf]  ;;  %v4406_v42 = vor.u32 %v3842_v29, %v2616_v30 }
  0x51   :  { %v4041_v6 = vld [vmem:[#allocation5 + $0x60c] sm:$0xf0]  ;;  %v3267_v20 = vor.u32 %v4009_v2, %v3266_v1  ;;  %v2980_v38 = vld [vmem:[#allocation5 + $0x2d0] sm:$0xf0]  ;;  %v3967_v39 = vld [vmem:[#allocation5 + $0x3c4] sm:$0xf]  ;;  %v4404_v41 = vor.u32 %v3846_v28, %v2622_v25  ;;  %v2855_v45 = vor.u32 %v3903_v33, %v2852_v34 }
  0x52   :  { %1590 = vmatpush.bf16.msrb.mxu2 %v3427_v50  ;;  %1604 = vmatpush.bf16.msrb.mxu3 %v2663_v54  ;;  %v3395_v21 = vor.u32 %v4041_v6, %v3394_v5  ;;  %v3108_v40 = vld [vmem:[#allocation5 + $0x3d0] sm:$0xf0]  ;;  %v3999_v43 = vld [vmem:[#allocation5 + $0x4c4] sm:$0xf]  ;;  %v2983_v46 = vor.u32 %v3935_v35, %v2980_v38 }
  0x53   :  { %1563 = vmatpush.bf16.msrb.mxu0 %v3155_v62  ;;  %v3236_v44 = vld [vmem:[#allocation5 + $0x4d0] sm:$0xf0]  ;;  %v3111_v47 = vor.u32 %v3967_v39, %v3108_v40  ;;  %v3899_v48 = vld [vmem:[#allocation5 + $0x1a4] sm:$0xf] }
  0x54   :  { %1577 = vmatpush.bf16.msrb.mxu1 %v3283_v3  ;;  %v2836_v49 = vld [vmem:[#allocation5 + $0x1b0] sm:$0xf0]  ;;  %v3931_v50 = vld [vmem:[#allocation5 + $0x2a4] sm:$0xf]  ;;  %v3239_v51 = vor.u32 %v3999_v43, %v3236_v44 }
  0x55   :  { %v2964_v52 = vld [vmem:[#allocation5 + $0x2b0] sm:$0xf0]  ;;  %v3963_v53 = vld [vmem:[#allocation5 + $0x3a4] sm:$0xf]  ;;  %v2839_v58 = vor.u32 %v3899_v48, %v2836_v49 }
  0x56   :  { %1591 = vmatpush.bf16.msrb.mxu2 %v3411_v4  ;;  %1605 = vmatpush.bf16.msrb.mxu3 %v2647_v8  ;;  %v3092_v54 = vld [vmem:[#allocation5 + $0x3b0] sm:$0xf0]  ;;  %v3995_v55 = vld [vmem:[#allocation5 + $0x4a4] sm:$0xf]  ;;  %v2967_v59 = vor.u32 %v3931_v50, %v2964_v52 }
  0x57   :  { %1564 = vmatpush.bf16.msrb.mxu0 %v3139_v16  ;;  %v3220_v56 = vld [vmem:[#allocation5 + $0x4b0] sm:$0xf0]  ;;  %v3095_v60 = vor.u32 %v3963_v53, %v3092_v54  ;;  %v3895_v61 = vld [vmem:[#allocation5 + $0x184] sm:$0xf] }
  0x58   :  { %1578 = vmatpush.bf16.msrb.mxu1 %v3267_v20  ;;  %v2820_v62 = vld [vmem:[#allocation5 + $0x190] sm:$0xf0]  ;;  %v3927_v63 = vld [vmem:[#allocation5 + $0x284] sm:$0xf]  ;;  %v3223_v1 = vor.u32 %v3995_v55, %v3220_v56 }
  0x59   :  { %v2948_v2 = vld [vmem:[#allocation5 + $0x290] sm:$0xf0]  ;;  %v3959_v3 = vld [vmem:[#allocation5 + $0x384] sm:$0xf]  ;;  %v2823_v7 = vor.u32 %v3895_v61, %v2820_v62 }
  0x5a   :  { %1592 = vmatpush.bf16.msrb.mxu2 %v3395_v21  ;;  %1606 = vmatpush.bf16.msrb.mxu3 %v2631_v26  ;;  %v3076_v4 = vld [vmem:[#allocation5 + $0x390] sm:$0xf0]  ;;  %v3991_v5 = vld [vmem:[#allocation5 + $0x484] sm:$0xf]  ;;  %v2951_v8 = vor.u32 %v3927_v63, %v2948_v2 }
  0x5b   :  { %1613 = vmatpush.bf16.msra.mxu0 %v2871_v27  ;;  %1579 = vmatmul.bf16.vlgmr.msrb.gmra.mxu1 %v4406_v42  ;;  %v3204_v6 = vld [vmem:[#allocation5 + $0x490] sm:$0xf0]  ;;  %v3079_v9 = vor.u32 %v3959_v3, %v3076_v4  ;;  %v3891_v10 = vld [vmem:[#allocation5 + $0x164] sm:$0xf]  ;;  %v2746_v3 = vld [vmem:[#allocation5 + $0xe8] sm:$0xf] }
  0x5c   :  { %1627 = vmatpush.bf16.msra.mxu1 %v2999_v31  ;;  %1565 = vmatmul.bf16.vlgmr.msrb.gmra.mxu0 %v4402_v37  ;;  %v2804_v12 = vld [vmem:[#allocation5 + $0x170] sm:$0xf0]  ;;  %v3923_v13 = vld [vmem:[#allocation5 + $0x264] sm:$0xf]  ;;  %v3207_v14 = vor.u32 %v3991_v5, %v3204_v6  ;;  %v3878_v4 = vld [vmem:[#allocation5 + $0xf4] sm:$0xf0] }
  0x5d   :  { %1593 = vmatmul.bf16.vlgmr.msrb.gmra.mxu2 %v4404_v41  ;;  %1607 = vmatmul.bf16.vlgmr.msrb.gmra.mxu3 %v4390_v57  ;;  %v2932_v15 = vld [vmem:[#allocation5 + $0x270] sm:$0xf0]  ;;  %v3955_v16 = vld [vmem:[#allocation5 + $0x364] sm:$0xf]  ;;  %v2807_v20 = vor.u32 %v3891_v10, %v2804_v12 }
  0x5e   :  { %1641 = vmatpush.bf16.msra.mxu2 %v3127_v32  ;;  %1655 = vmatpush.bf16.msra.mxu3 %v3255_v36  ;;  %v3060_v17 = vld [vmem:[#allocation5 + $0x370] sm:$0xf0]  ;;  %v3987_v18 = vld [vmem:[#allocation5 + $0x464] sm:$0xf]  ;;  %v2935_v21 = vor.u32 %v3923_v13, %v2932_v15  ;;  %v2747_v13 = vor.u32 %v3878_v4, %v2746_v3 }
  0x5f   :  { %1614 = vmatpush.bf16.msra.mxu0 %v2855_v45  ;;  %v3188_v19 = vld [vmem:[#allocation5 + $0x470] sm:$0xf0]  ;;  %v3063_v22 = vor.u32 %v3955_v16, %v3060_v17  ;;  %v3887_v24 = vld [vmem:[#allocation5 + $0x144] sm:$0xf] }
  0x60   :  { %1628 = vmatpush.bf16.msra.mxu1 %v2983_v46  ;;  %v2788_v25 = vld [vmem:[#allocation5 + $0x150] sm:$0xf0]  ;;  %v3919_v26 = vld [vmem:[#allocation5 + $0x244] sm:$0xf]  ;;  %v3191_v27 = vor.u32 %v3987_v18, %v3188_v19  ;;  %v2730_v19 = vld [vmem:[#allocation5 + $0xc8] sm:$0xf] }
  0x61   :  { %v2916_v28 = vld [vmem:[#allocation5 + $0x250] sm:$0xf0]  ;;  %v3951_v29 = vld [vmem:[#allocation5 + $0x344] sm:$0xf]  ;;  %v2791_v33 = vor.u32 %v3887_v24, %v2788_v25 }
  0x62   :  { %1642 = vmatpush.bf16.msra.mxu2 %v3111_v47  ;;  %1656 = vmatpush.bf16.msra.mxu3 %v3239_v51  ;;  %v3044_v30 = vld [vmem:[#allocation5 + $0x350] sm:$0xf0]  ;;  %v3983_v31 = vld [vmem:[#allocation5 + $0x444] sm:$0xf]  ;;  %v2919_v34 = vor.u32 %v3919_v26, %v2916_v28 }
  0x63   :  { %1615 = vmatpush.bf16.msra.mxu0 %v2839_v58  ;;  %v3172_v32 = vld [vmem:[#allocation5 + $0x450] sm:$0xf0]  ;;  %v3047_v35 = vor.u32 %v3951_v29, %v3044_v30  ;;  %v3883_v36 = vld [vmem:[#allocation5 + $0x124] sm:$0xf] }
  0x64   :  { %1629 = vmatpush.bf16.msra.mxu1 %v2967_v59  ;;  %v2772_v38 = vld [vmem:[#allocation5 + $0x130] sm:$0xf0]  ;;  %v3915_v39 = vld [vmem:[#allocation5 + $0x224] sm:$0xf]  ;;  %v3175_v40 = vor.u32 %v3983_v31, %v3172_v32  ;;  %v2714_v32 = vld [vmem:[#allocation5 + $0xa8] sm:$0xf] }
  0x65   :  { %v2900_v43 = vld [vmem:[#allocation5 + $0x230] sm:$0xf0]  ;;  %v3947_v44 = vld [vmem:[#allocation5 + $0x324] sm:$0xf]  ;;  %v2775_v48 = vor.u32 %v3883_v36, %v2772_v38 }
  0x66   :  { %1643 = vmatpush.bf16.msra.mxu2 %v3095_v60  ;;  %1657 = vmatpush.bf16.msra.mxu3 %v3223_v1  ;;  %v3028_v45 = vld [vmem:[#allocation5 + $0x330] sm:$0xf0]  ;;  %v3979_v46 = vld [vmem:[#allocation5 + $0x424] sm:$0xf]  ;;  %v2903_v51 = vor.u32 %v3915_v39, %v2900_v43 }
  0x67   :  { %1616 = vmatpush.bf16.msra.mxu0 %v2823_v7  ;;  %v3156_v47 = vld [vmem:[#allocation5 + $0x430] sm:$0xf0]  ;;  %v3879_v49 = vld [vmem:[#allocation5 + $0x104] sm:$0xf]  ;;  %v3031_v52 = vor.u32 %v3947_v44, %v3028_v45  ;;  %v2874_v7 = vld [vmem:[#allocation5 + $0x1e8] sm:$0xf] }
  0x68   :  { %1630 = vmatpush.bf16.msra.mxu1 %v2951_v8  ;;  %v2756_v50 = vld [vmem:[#allocation5 + $0x110] sm:$0xf0]  ;;  %v3911_v53 = vld [vmem:[#allocation5 + $0x204] sm:$0xf]  ;;  %v3159_v56 = vor.u32 %v3979_v46, %v3156_v47  ;;  %v3910_v8 = vld [vmem:[#allocation5 + $0x1f4] sm:$0xf0] }
  0x69   :  { %v2884_v54 = vld [vmem:[#allocation5 + $0x210] sm:$0xf0]  ;;  %v3943_v55 = vld [vmem:[#allocation5 + $0x304] sm:$0xf]  ;;  %v2759_v1 = vor.u32 %v3879_v49, %v2756_v50  ;;  %v2875_v17 = vor.u32 %v3910_v8, %v2874_v7  ;;  %v2698_v47 = vld [vmem:[#allocation5 + $0x88] sm:$0xf] }
  0x6a   :  { %1644 = vmatpush.bf16.msra.mxu2 %v3079_v9  ;;  %1658 = vmatpush.bf16.msra.mxu3 %v3207_v14  ;;  %v3012_v58 = vld [vmem:[#allocation5 + $0x310] sm:$0xf0]  ;;  %v3975_v59 = vld [vmem:[#allocation5 + $0x404] sm:$0xf]  ;;  %v2887_v5 = vor.u32 %v3911_v53, %v2884_v54  ;;  %v2826_v49 = vld [vmem:[#allocation5 + $0x188] sm:$0xf] }
  0x6b   :  { %1617 = vmatpush.bf16.msra.mxu0 %v2807_v20  ;;  %v3140_v60 = vld [vmem:[#allocation5 + $0x410] sm:$0xf0]  ;;  %v4035_v61 = vld [vmem:[#allocation5 + $0x5e4] sm:$0xf]  ;;  %v3015_v6 = vor.u32 %v3943_v55, %v3012_v58  ;;  %v3874_v20 = vld [vmem:[#allocation5 + $0xd4] sm:$0xf0] }
  0x6c   :  { %1631 = vmatpush.bf16.msra.mxu1 %v2935_v21  ;;  %v3380_v62 = vld [vmem:[#allocation5 + $0x5f0] sm:$0xf0]  ;;  %v4067_v63 = vld [vmem:[#allocation5 + $0x6e4] sm:$0xf]  ;;  %v3143_v9 = vor.u32 %v3975_v59, %v3140_v60  ;;  %v2858_v21 = vld [vmem:[#allocation5 + $0x1c8] sm:$0xf]  ;;  %v2731_v26 = vor.u32 %v3874_v20, %v2730_v19 }
  0x6d   :  { %v3508_v2 = vld [vmem:[#allocation5 + $0x6f0] sm:$0xf0]  ;;  %v3383_v10 = vor.u32 %v4035_v61, %v3380_v62  ;;  %v4031_v14 = vld [vmem:[#allocation5 + $0x5c4] sm:$0xf]  ;;  %v3898_v50 = vld [vmem:[#allocation5 + $0x194] sm:$0xf0] }
  0x6e   :  { %1645 = vmatpush.bf16.msra.mxu2 %v3063_v22  ;;  %1659 = vmatpush.bf16.msra.mxu3 %v3191_v27  ;;  %v3511_v12 = vor.u32 %v4067_v63, %v3508_v2  ;;  %v3364_v15 = vld [vmem:[#allocation5 + $0x5d0] sm:$0xf0]  ;;  %v4063_v16 = vld [vmem:[#allocation5 + $0x6c4] sm:$0xf]  ;;  %v3906_v22 = vld [vmem:[#allocation5 + $0x1d4] sm:$0xf0]  ;;  %v2827_v58 = vor.u32 %v3898_v50, %v2826_v49 }
  0x6f   :  { %1618 = vmatpush.bf16.msra.mxu0 %v2791_v33  ;;  %v3492_v18 = vld [vmem:[#allocation5 + $0x6d0] sm:$0xf0]  ;;  %v3367_v24 = vor.u32 %v4031_v14, %v3364_v15  ;;  %v4027_v27 = vld [vmem:[#allocation5 + $0x5a4] sm:$0xf]  ;;  %v2859_v30 = vor.u32 %v3906_v22, %v2858_v21  ;;  %v3870_v33 = vld [vmem:[#allocation5 + $0xb4] sm:$0xf0] }
  0x70   :  { %1632 = vmatpush.bf16.msra.mxu1 %v2919_v34  ;;  %v3495_v25 = vor.u32 %v4063_v16, %v3492_v18  ;;  %v3348_v28 = vld [vmem:[#allocation5 + $0x5b0] sm:$0xf0]  ;;  %v4059_v29 = vld [vmem:[#allocation5 + $0x6a4] sm:$0xf]  ;;  %v2842_v34 = vld [vmem:[#allocation5 + $0x1a8] sm:$0xf]  ;;  %v2715_v39 = vor.u32 %v3870_v33, %v2714_v32 }
  0x71   :  { %v3476_v31 = vld [vmem:[#allocation5 + $0x6b0] sm:$0xf0]  ;;  %v3351_v36 = vor.u32 %v4027_v27, %v3348_v28  ;;  %v4055_v44 = vld [vmem:[#allocation5 + $0x684] sm:$0xf]  ;;  %v2682_v60 = vld [vmem:[#allocation5 + $0x68] sm:$0xf] }
  0x72   :  { %1646 = vmatpush.bf16.msra.mxu2 %v3047_v35  ;;  %1660 = vmatpush.bf16.msra.mxu3 %v3175_v40  ;;  %v3902_v35 = vld [vmem:[#allocation5 + $0x1b4] sm:$0xf0]  ;;  %v3479_v38 = vor.u32 %v4059_v29, %v3476_v31  ;;  %v4023_v40 = vld [vmem:[#allocation5 + $0x584] sm:$0xf]  ;;  %v3332_v43 = vld [vmem:[#allocation5 + $0x590] sm:$0xf0] }
  0x73   :  { %1619 = vmatpush.bf16.msra.mxu0 %v2775_v48  ;;  %v2843_v45 = vor.u32 %v3902_v35, %v2842_v34  ;;  %v3460_v46 = vld [vmem:[#allocation5 + $0x690] sm:$0xf0]  ;;  %v3866_v48 = vld [vmem:[#allocation5 + $0x94] sm:$0xf0]  ;;  %v4019_v54 = vld [vmem:[#allocation5 + $0x564] sm:$0xf] }
  0x74   :  { %1633 = vmatpush.bf16.msra.mxu1 %v2903_v51  ;;  %v3335_v51 = vor.u32 %v4023_v40, %v3332_v43  ;;  %v2699_v53 = vor.u32 %v3866_v48, %v2698_v47  ;;  %v3316_v55 = vld [vmem:[#allocation5 + $0x570] sm:$0xf0]  ;;  %v3862_v61 = vld [vmem:[#allocation5 + $0x74] sm:$0xf0]  ;;  %v2810_v62 = vld [vmem:[#allocation5 + $0x168] sm:$0xf] }
  0x75   :  { %v3444_v59 = vld [vmem:[#allocation5 + $0x670] sm:$0xf0]  ;;  %v3894_v63 = vld [vmem:[#allocation5 + $0x174] sm:$0xf0]  ;;  %v2683_v3 = vor.u32 %v3862_v61, %v2682_v60  ;;  %v4015_v4 = vld [vmem:[#allocation5 + $0x544] sm:$0xf] }
  0x76   :  { %1647 = vmatpush.bf16.msra.mxu2 %v3031_v52  ;;  %1661 = vmatpush.bf16.msra.mxu3 %v3159_v56  ;;  %v3463_v52 = vor.u32 %v4055_v44, %v3460_v46  ;;  %v4051_v56 = vld [vmem:[#allocation5 + $0x664] sm:$0xf]  ;;  %v2811_v7 = vor.u32 %v3894_v63, %v2810_v62  ;;  %v3428_v8 = vld [vmem:[#allocation5 + $0x650] sm:$0xf0]  ;;  %v2650_v22 = vld [vmem:[#allocation5 + $0x28] sm:$0xf] }
  0x77   :  { %1620 = vmatpush.bf16.msra.mxu0 %v2759_v1  ;;  %v3319_v1 = vor.u32 %v4019_v54, %v3316_v55  ;;  %v3447_v2 = vor.u32 %v4051_v56, %v3444_v59  ;;  %v3284_v18 = vld [vmem:[#allocation5 + $0x530] sm:$0xf0]  ;;  %v4043_v19 = vld [vmem:[#allocation5 + $0x624] sm:$0xf]  ;;  %v2634_v34 = vld [vmem:[#allocation5 + $0x8] sm:$0xf] }
  0x78   :  { %1634 = vmatpush.bf16.msra.mxu1 %v2887_v5  ;;  %v3300_v5 = vld [vmem:[#allocation5 + $0x550] sm:$0xf0]  ;;  %v4007_v28 = vld [vmem:[#allocation5 + $0x504] sm:$0xf]  ;;  %v3002_v40 = vld [vmem:[#allocation5 + $0x2e8] sm:$0xf] }
  0x79   :  { %v3303_v14 = vor.u32 %v4015_v4, %v3300_v5  ;;  %v3412_v21 = vld [vmem:[#allocation5 + $0x630] sm:$0xf0]  ;;  %v4039_v32 = vld [vmem:[#allocation5 + $0x604] sm:$0xf]  ;;  %v3942_v43 = vld [vmem:[#allocation5 + $0x2f4] sm:$0xf0] }
  0x7a   :  { %1648 = vmatpush.bf16.msra.mxu2 %v3015_v6  ;;  %1662 = vmatpush.bf16.msra.mxu3 %v3143_v9  ;;  %v4047_v6 = vld [vmem:[#allocation5 + $0x644] sm:$0xf]  ;;  %v2666_v9 = vld [vmem:[#allocation5 + $0x48] sm:$0xf]  ;;  %v3268_v29 = vld [vmem:[#allocation5 + $0x510] sm:$0xf0]  ;;  %v3003_v54 = vor.u32 %v3942_v43, %v3002_v40 }
  0x7b   :  { %1669 = vmatpush.bf16.msrb.mxu0 %v3383_v10  ;;  %1635 = vmatmul.bf16.vlgmr.msra.gmra.mxu1 %v4392_v0  ;;  %v3858_v10 = vld [vmem:[#allocation5 + $0x54] sm:$0xf0]  ;;  %v3431_v15 = vor.u32 %v4047_v6, %v3428_v8  ;;  %v3396_v33 = vld [vmem:[#allocation5 + $0x610] sm:$0xf0]  ;;  %v3130_v44 = vld [vmem:[#allocation5 + $0x3e8] sm:$0xf] }
  0x7c   :  { %1683 = vmatpush.bf16.msrb.mxu1 %v3511_v12  ;;  %1621 = vmatmul.bf16.vlgmr.msra.gmra.mxu0 %v4396_v11  ;;  %v2794_v12 = vld [vmem:[#allocation5 + $0x148] sm:$0xf]  ;;  %v2667_v16 = vor.u32 %v3858_v10, %v2666_v9  ;;  %v3974_v46 = vld [vmem:[#allocation5 + $0x3f4] sm:$0xf0]  ;;  %v3399_v49 = vor.u32 %v4039_v32, %v3396_v33 }
  0x7d   :  { %1649 = vmatmul.bf16.vlgmr.msra.gmra.mxu2 %v4399_v23  ;;  %1663 = vmatmul.bf16.vlgmr.msra.gmra.mxu3 %v4402_v37  ;;  %v3258_v47 = vld [vmem:[#allocation5 + $0x4e8] sm:$0xf]  ;;  %v4006_v48 = vld [vmem:[#allocation5 + $0x4f4] sm:$0xf0]  ;;  %v3131_v55 = vor.u32 %v3974_v46, %v3130_v44 }
  0x7e   :  { %1697 = vmatpush.bf16.msrb.mxu2 %v2747_v13  ;;  %1711 = vmatpush.bf16.msrb.mxu3 %v2875_v17  ;;  %v3890_v13 = vld [vmem:[#allocation5 + $0x154] sm:$0xf0]  ;;  %v4011_v17 = vld [vmem:[#allocation5 + $0x524] sm:$0xf]  ;;  %v3259_v56 = vor.u32 %v4006_v48, %v3258_v47  ;;  %v3114_v60 = vld [vmem:[#allocation5 + $0x3c8] sm:$0xf] }
  0x7f   :  { %1670 = vmatpush.bf16.msrb.mxu0 %v3367_v24  ;;  %v2795_v20 = vor.u32 %v3890_v13, %v2794_v12  ;;  %v3854_v24 = vld [vmem:[#allocation5 + $0x34] sm:$0xf0]  ;;  %v3287_v27 = vor.u32 %v4011_v17, %v3284_v18  ;;  %v3242_v63 = vld [vmem:[#allocation5 + $0x4c8] sm:$0xf] }
  0x80   :  { %1684 = vmatpush.bf16.msrb.mxu1 %v3495_v25  ;;  %v2778_v25 = vld [vmem:[#allocation5 + $0x128] sm:$0xf]  ;;  %v2651_v31 = vor.u32 %v3854_v24, %v2650_v22  ;;  %v3938_v59 = vld [vmem:[#allocation5 + $0x2d4] sm:$0xf0] }
  0x81   :  { %v3970_v62 = vld [vmem:[#allocation5 + $0x3d4] sm:$0xf0]  ;;  %v3098_v9 = vld [vmem:[#allocation5 + $0x3a8] sm:$0xf] }
  0x82   :  { %1698 = vmatpush.bf16.msrb.mxu2 %v2731_v26  ;;  %1712 = vmatpush.bf16.msrb.mxu3 %v2859_v30  ;;  %v3886_v26 = vld [vmem:[#allocation5 + $0x134] sm:$0xf0]  ;;  %v3415_v30 = vor.u32 %v4043_v19, %v3412_v21  ;;  %v3115_v5 = vor.u32 %v3970_v62, %v3114_v60  ;;  %v3226_v13 = vld [vmem:[#allocation5 + $0x4a8] sm:$0xf] }
  0x83   :  { %1671 = vmatpush.bf16.msrb.mxu0 %v3351_v36  ;;  %v2779_v35 = vor.u32 %v3886_v26, %v2778_v25  ;;  %v3850_v36 = vld [vmem:[#allocation5 + $0x14] sm:$0xf0]  ;;  %v3082_v22 = vld [vmem:[#allocation5 + $0x388] sm:$0xf] }
  0x84   :  { %1685 = vmatpush.bf16.msrb.mxu1 %v3479_v38  ;;  %v2762_v38 = vld [vmem:[#allocation5 + $0x108] sm:$0xf]  ;;  %v2635_v50 = vor.u32 %v3850_v36, %v2634_v34  ;;  %v3934_v8 = vld [vmem:[#allocation5 + $0x2b4] sm:$0xf0] }
  0x85   :  { %v3966_v12 = vld [vmem:[#allocation5 + $0x3b4] sm:$0xf0]  ;;  %v3210_v26 = vld [vmem:[#allocation5 + $0x488] sm:$0xf] }
  0x86   :  { %1699 = vmatpush.bf16.msrb.mxu2 %v2715_v39  ;;  %1713 = vmatpush.bf16.msrb.mxu3 %v2843_v45  ;;  %v3882_v39 = vld [vmem:[#allocation5 + $0x114] sm:$0xf0]  ;;  %v3271_v45 = vor.u32 %v4007_v28, %v3268_v29  ;;  %v3099_v18 = vor.u32 %v3966_v12, %v3098_v9  ;;  %v3338_v28 = vld [vmem:[#allocation5 + $0x588] sm:$0xf] }
  0x87   :  { %1672 = vmatpush.bf16.msrb.mxu0 %v3335_v51  ;;  %v3386_v51 = vld [vmem:[#allocation5 + $0x5e8] sm:$0xf]  ;;  %v3930_v21 = vld [vmem:[#allocation5 + $0x294] sm:$0xf0] }
  0x88   :  { %1686 = vmatpush.bf16.msrb.mxu1 %v3463_v52  ;;  %v4038_v52 = vld [vmem:[#allocation5 + $0x5f4] sm:$0xf0]  ;;  %v2938_v33 = vld [vmem:[#allocation5 + $0x268] sm:$0xf] }
  0x89   :  { %v3387_v61 = vor.u32 %v4038_v52, %v3386_v51  ;;  %v3962_v25 = vld [vmem:[#allocation5 + $0x394] sm:$0xf0]  ;;  %v3322_v43 = vld [vmem:[#allocation5 + $0x568] sm:$0xf] }
  0x8a   :  { %1700 = vmatpush.bf16.msrb.mxu2 %v2699_v53  ;;  %1714 = vmatpush.bf16.msrb.mxu3 %v2827_v58  ;;  %v2763_v53 = vor.u32 %v3882_v39, %v2762_v38  ;;  %v2986_v58 = vld [vmem:[#allocation5 + $0x2c8] sm:$0xf]  ;;  %v4026_v29 = vld [vmem:[#allocation5 + $0x594] sm:$0xf0] }
  0x8b   :  { %1673 = vmatpush.bf16.msrb.mxu0 %v3319_v1  ;;  %v4002_v1 = vld [vmem:[#allocation5 + $0x4d4] sm:$0xf0]  ;;  %v2987_v4 = vor.u32 %v3938_v59, %v2986_v58  ;;  %v3339_v36 = vor.u32 %v4026_v29, %v3338_v28  ;;  %v3194_v39 = vld [vmem:[#allocation5 + $0x468] sm:$0xf] }
  0x8c   :  { %1687 = vmatpush.bf16.msrb.mxu1 %v3447_v2  ;;  %v3370_v2 = vld [vmem:[#allocation5 + $0x5c8] sm:$0xf]  ;;  %v3243_v6 = vor.u32 %v4002_v1, %v3242_v63  ;;  %v3926_v34 = vld [vmem:[#allocation5 + $0x274] sm:$0xf0] }
  0x8d   :  { %v3958_v38 = vld [vmem:[#allocation5 + $0x374] sm:$0xf0]  ;;  %v2922_v48 = vld [vmem:[#allocation5 + $0x248] sm:$0xf] }
  0x8e   :  { %1701 = vmatpush.bf16.msrb.mxu2 %v2683_v3  ;;  %1715 = vmatpush.bf16.msrb.mxu3 %v2811_v7  ;;  %v4034_v3 = vld [vmem:[#allocation5 + $0x5d4] sm:$0xf0]  ;;  %v2970_v7 = vld [vmem:[#allocation5 + $0x2a8] sm:$0xf] }
  0x8f   :  { %1674 = vmatpush.bf16.msrb.mxu0 %v3303_v14  ;;  %v3371_v10 = vor.u32 %v4034_v3, %v3370_v2  ;;  %v3998_v14 = vld [vmem:[#allocation5 + $0x4b4] sm:$0xf0]  ;;  %v2971_v17 = vor.u32 %v3934_v8, %v2970_v7  ;;  %v3034_v63 = vld [vmem:[#allocation5 + $0x328] sm:$0xf] }
  0x90   :  { %1688 = vmatpush.bf16.msrb.mxu1 %v3431_v15  ;;  %v3354_v15 = vld [vmem:[#allocation5 + $0x5a8] sm:$0xf]  ;;  %v3227_v19 = vor.u32 %v3998_v14, %v3226_v13  ;;  %v3990_v40 = vld [vmem:[#allocation5 + $0x474] sm:$0xf0] }
  0x91   :  { %v4022_v44 = vld [vmem:[#allocation5 + $0x574] sm:$0xf0]  ;;  %v3195_v47 = vor.u32 %v3990_v40, %v3194_v39  ;;  %v3162_v3 = vld [vmem:[#allocation5 + $0x428] sm:$0xf]  ;;  %v3872_v39 = vld [vmem:[#allocation5 + $0xcc] sm:$0xf] }
  0x92   :  { %1702 = vmatpush.bf16.msrb.mxu2 %v2667_v16  ;;  %1716 = vmatpush.bf16.msrb.mxu3 %v2795_v20  ;;  %v4030_v16 = vld [vmem:[#allocation5 + $0x5b4] sm:$0xf0]  ;;  %v2954_v20 = vld [vmem:[#allocation5 + $0x288] sm:$0xf]  ;;  %v3323_v51 = vor.u32 %v4022_v44, %v3322_v43  ;;  %v2732_v43 = vld [vmem:[#allocation5 + $0xd8] sm:$0xf0] }
  0x93   :  { %1675 = vmatpush.bf16.msrb.mxu0 %v3287_v27  ;;  %v3355_v24 = vor.u32 %v4030_v16, %v3354_v15  ;;  %v3994_v27 = vld [vmem:[#allocation5 + $0x494] sm:$0xf0]  ;;  %v2890_v8 = vld [vmem:[#allocation5 + $0x208] sm:$0xf]  ;;  %v3904_v44 = vld [vmem:[#allocation5 + $0x1cc] sm:$0xf] }
  0x94   :  { %1689 = vmatpush.bf16.msrb.mxu1 %v3415_v30  ;;  %v2955_v30 = vor.u32 %v3930_v21, %v2954_v20  ;;  %v3211_v32 = vor.u32 %v3994_v27, %v3210_v26  ;;  %v3954_v52 = vld [vmem:[#allocation5 + $0x354] sm:$0xf0]  ;;  %v3018_v13 = vld [vmem:[#allocation5 + $0x308] sm:$0xf]  ;;  %v3908_v26 = vld [vmem:[#allocation5 + $0x1ec] sm:$0xf] }
  0x95   :  { %v3918_v62 = vld [vmem:[#allocation5 + $0x234] sm:$0xf0]  ;;  %v3146_v15 = vld [vmem:[#allocation5 + $0x408] sm:$0xf]  ;;  %v2876_v27 = vld [vmem:[#allocation5 + $0x1f8] sm:$0xf0] }
  0x96   :  { %1703 = vmatpush.bf16.msrb.mxu2 %v2651_v31  ;;  %1717 = vmatpush.bf16.msrb.mxu3 %v2779_v35  ;;  %v3083_v31 = vor.u32 %v3962_v25, %v3082_v22  ;;  %v3066_v35 = vld [vmem:[#allocation5 + $0x368] sm:$0xf]  ;;  %v3950_v2 = vld [vmem:[#allocation5 + $0x334] sm:$0xf0]  ;;  %v3876_v22 = vld [vmem:[#allocation5 + $0xec] sm:$0xf] }
  0x97   :  { %1676 = vmatpush.bf16.msrb.mxu0 %v3271_v45  ;;  %v2939_v45 = vor.u32 %v3926_v34, %v2938_v33  ;;  %v3067_v46 = vor.u32 %v3958_v38, %v3066_v35  ;;  %v3914_v9 = vld [vmem:[#allocation5 + $0x214] sm:$0xf0]  ;;  %v3514_v20 = vld [vmem:[#allocation5 + $0x6e8] sm:$0xf]  ;;  %v2748_v25 = vld [vmem:[#allocation5 + $0xf8] sm:$0xf0]  ;;  %v2879_v35 = vor.u32 %v3908_v26, %v2876_v27 }
  0x98   :  { %1690 = vmatpush.bf16.msrb.mxu1 %v3399_v49  ;;  %v3922_v49 = vld [vmem:[#allocation5 + $0x254] sm:$0xf0]  ;;  %v2751_v34 = vor.u32 %v3876_v22, %v2748_v25  ;;  %v2940_v22 = vld [vmem:[#allocation5 + $0x278] sm:$0xf0]  ;;  %v3434_v27 = vld [vmem:[#allocation5 + $0x648] sm:$0xf] }
  0x99   :  { %v2923_v58 = vor.u32 %v3922_v49, %v2922_v48  ;;  %v3946_v14 = vld [vmem:[#allocation5 + $0x314] sm:$0xf0]  ;;  %v2735_v49 = vor.u32 %v3872_v39, %v2732_v43 }
  0x9a   :  { %1704 = vmatpush.bf16.msrb.mxu2 %v2635_v50  ;;  %1718 = vmatpush.bf16.msrb.mxu3 %v2763_v53  ;;  %v3050_v50 = vld [vmem:[#allocation5 + $0x348] sm:$0xf]  ;;  %v4070_v21 = vld [vmem:[#allocation5 + $0x6f4] sm:$0xf0]  ;;  %v3019_v28 = vor.u32 %v3946_v14, %v3018_v13 }
  0x9b   :  { %1725 = vmatpush.bf16.msra.mxu0 %v3003_v54  ;;  %1691 = vmatmul.bf16.vlgmr.msrb.gmra.mxu1 %v4404_v41  ;;  %v3178_v53 = vld [vmem:[#allocation5 + $0x448] sm:$0xf]  ;;  %v3986_v54 = vld [vmem:[#allocation5 + $0x454] sm:$0xf0]  ;;  %v3051_v59 = vor.u32 %v3954_v52, %v3050_v50  ;;  %v3515_v33 = vor.u32 %v4070_v21, %v3514_v20  ;;  %v2812_v20 = vld [vmem:[#allocation5 + $0x178] sm:$0xf0] }
  0x9c   :  { %1739 = vmatpush.bf16.msra.mxu1 %v3131_v55  ;;  %1677 = vmatmul.bf16.vlgmr.msrb.gmra.mxu0 %v4406_v42  ;;  %v3306_v55 = vld [vmem:[#allocation5 + $0x548] sm:$0xf]  ;;  %v3179_v60 = vor.u32 %v3986_v54, %v3178_v53  ;;  %v4066_v38 = vld [vmem:[#allocation5 + $0x6d4] sm:$0xf0]  ;;  %v3868_v53 = vld [vmem:[#allocation5 + $0xac] sm:$0xf] }
  0x9d   :  { %1705 = vmatmul.bf16.vlgmr.msrb.gmra.mxu2 %v4390_v57  ;;  %1719 = vmatmul.bf16.vlgmr.msrb.gmra.mxu3 %v4396_v11  ;;  %v4062_v52 = vld [vmem:[#allocation5 + $0x6b4] sm:$0xf0]  ;;  %v3450_v14 = vld [vmem:[#allocation5 + $0x668] sm:$0xf]  ;;  %v3924_v21 = vld [vmem:[#allocation5 + $0x26c] sm:$0xf] }
  0x9e   :  { %1753 = vmatpush.bf16.msra.mxu2 %v3259_v56  ;;  %1767 = vmatpush.bf16.msra.mxu3 %v3387_v61  ;;  %v4018_v56 = vld [vmem:[#allocation5 + $0x554] sm:$0xf0]  ;;  %v2906_v61 = vld [vmem:[#allocation5 + $0x228] sm:$0xf] }
  0x9f   :  { %1726 = vmatpush.bf16.msra.mxu0 %v2987_v4  ;;  %v3307_v1 = vor.u32 %v4018_v56, %v3306_v55  ;;  %v3982_v4 = vld [vmem:[#allocation5 + $0x434] sm:$0xf0]  ;;  %v2907_v7 = vor.u32 %v3918_v62, %v2906_v61  ;;  %v2716_v55 = vld [vmem:[#allocation5 + $0xb8] sm:$0xf0]  ;;  %v3900_v56 = vld [vmem:[#allocation5 + $0x1ac] sm:$0xf] }
  0xa0   :  { %1740 = vmatpush.bf16.msra.mxu1 %v3115_v5  ;;  %v3290_v5 = vld [vmem:[#allocation5 + $0x528] sm:$0xf]  ;;  %v3163_v12 = vor.u32 %v3982_v4, %v3162_v3  ;;  %v2719_v62 = vor.u32 %v3868_v53, %v2716_v55  ;;  %v3864_v3 = vld [vmem:[#allocation5 + $0x8c] sm:$0xf]  ;;  %v4046_v43 = vld [vmem:[#allocation5 + $0x634] sm:$0xf0] }
  0xa1   :  { %v4042_v53 = vld [vmem:[#allocation5 + $0x614] sm:$0xf0] }
  0xa2   :  { %1754 = vmatpush.bf16.msra.mxu2 %v3243_v6  ;;  %1768 = vmatpush.bf16.msra.mxu3 %v3371_v10  ;;  %v4014_v6 = vld [vmem:[#allocation5 + $0x534] sm:$0xf0]  ;;  %v3035_v10 = vor.u32 %v3950_v2, %v3034_v63 }
  0xa3   :  { %1727 = vmatpush.bf16.msra.mxu0 %v2971_v17  ;;  %v3291_v16 = vor.u32 %v4014_v6, %v3290_v5  ;;  %v3978_v17 = vld [vmem:[#allocation5 + $0x414] sm:$0xf0]  ;;  %v2700_v5 = vld [vmem:[#allocation5 + $0x98] sm:$0xf0]  ;;  %v3896_v6 = vld [vmem:[#allocation5 + $0x18c] sm:$0xf] }
  0xa4   :  { %1741 = vmatpush.bf16.msra.mxu1 %v3099_v18  ;;  %v3274_v18 = vld [vmem:[#allocation5 + $0x508] sm:$0xf]  ;;  %v3147_v29 = vor.u32 %v3978_v17, %v3146_v15  ;;  %v4058_v2 = vld [vmem:[#allocation5 + $0x694] sm:$0xf0] }
  0xa5   :  { %v4054_v15 = vld [vmem:[#allocation5 + $0x674] sm:$0xf0] }
  0xa6   :  { %1755 = vmatpush.bf16.msra.mxu2 %v3227_v19  ;;  %1769 = vmatpush.bf16.msra.mxu3 %v3355_v24  ;;  %v4010_v19 = vld [vmem:[#allocation5 + $0x514] sm:$0xf0]  ;;  %v2891_v24 = vor.u32 %v3914_v9, %v2890_v8  ;;  %v3928_v8 = vld [vmem:[#allocation5 + $0x28c] sm:$0xf]  ;;  %v2956_v9 = vld [vmem:[#allocation5 + $0x298] sm:$0xf0] }
  0xa7   :  { %1728 = vmatpush.bf16.msra.mxu0 %v2955_v30  ;;  %v3940_v30 = vld [vmem:[#allocation5 + $0x2ec] sm:$0xf]  ;;  %v2959_v17 = vor.u32 %v3928_v8, %v2956_v9 }
  0xa8   :  { %1742 = vmatpush.bf16.msra.mxu1 %v3083_v31  ;;  %v3004_v31 = vld [vmem:[#allocation5 + $0x2f8] sm:$0xf0] }
  0xa9   :  { %v3007_v40 = vor.u32 %v3940_v30, %v3004_v31  ;;  %v2943_v30 = vor.u32 %v3924_v21, %v2940_v22  ;;  %v2668_v31 = vld [vmem:[#allocation5 + $0x58] sm:$0xf0]  ;;  %v4032_v22 = vld [vmem:[#allocation5 + $0x5cc] sm:$0xf] }
  0xaa   :  { %1756 = vmatpush.bf16.msra.mxu2 %v3211_v32  ;;  %1770 = vmatpush.bf16.msra.mxu3 %v3339_v36  ;;  %v3275_v32 = vor.u32 %v4010_v19, %v3274_v18  ;;  %v3498_v36 = vld [vmem:[#allocation5 + $0x6c8] sm:$0xf]  ;;  %v2684_v18 = vld [vmem:[#allocation5 + $0x78] sm:$0xf0]  ;;  %v3892_v19 = vld [vmem:[#allocation5 + $0x16c] sm:$0xf] }
  0xab   :  { %1729 = vmatpush.bf16.msra.mxu0 %v2939_v45  ;;  %v2860_v45 = vld [vmem:[#allocation5 + $0x1d8] sm:$0xf0]  ;;  %v3499_v48 = vor.u32 %v4066_v38, %v3498_v36  ;;  %v2815_v26 = vor.u32 %v3892_v19, %v2812_v20  ;;  %v4000_v19 = vld [vmem:[#allocation5 + $0x4cc] sm:$0xf] }
  0xac   :  { %1743 = vmatpush.bf16.msra.mxu1 %v3067_v46  ;;  %v3936_v46 = vld [vmem:[#allocation5 + $0x2cc] sm:$0xf]  ;;  %v2863_v50 = vor.u32 %v3904_v44, %v2860_v45  ;;  %v3244_v21 = vld [vmem:[#allocation5 + $0x4d8] sm:$0xf0] }
  0xad   :  { %v3852_v44 = vld [vmem:[#allocation5 + $0x2c] sm:$0xf] }
  0xae   :  { %1757 = vmatpush.bf16.msra.mxu2 %v3195_v47  ;;  %1771 = vmatpush.bf16.msra.mxu3 %v3323_v51  ;;  %v2988_v47 = vld [vmem:[#allocation5 + $0x2d8] sm:$0xf0]  ;;  %v3482_v51 = vld [vmem:[#allocation5 + $0x6a8] sm:$0xf] }
  0xaf   :  { %1730 = vmatpush.bf16.msra.mxu0 %v2923_v58  ;;  %v2991_v54 = vor.u32 %v3936_v46, %v2988_v47  ;;  %v2844_v58 = vld [vmem:[#allocation5 + $0x1b8] sm:$0xf0]  ;;  %v3483_v61 = vor.u32 %v4062_v52, %v3482_v51  ;;  %v3884_v47 = vld [vmem:[#allocation5 + $0x12c] sm:$0xf]  ;;  %v3402_v52 = vld [vmem:[#allocation5 + $0x608] sm:$0xf] }
  0xb0   :  { %1744 = vmatpush.bf16.msra.mxu1 %v3051_v59  ;;  %v3932_v59 = vld [vmem:[#allocation5 + $0x2ac] sm:$0xf]  ;;  %v2847_v63 = vor.u32 %v3900_v56, %v2844_v58  ;;  %v2652_v46 = vld [vmem:[#allocation5 + $0x38] sm:$0xf0] }
  0xb1   :  { %v3848_v56 = vld [vmem:[#allocation5 + $0xc] sm:$0xf]  ;;  %v2636_v58 = vld [vmem:[#allocation5 + $0x18] sm:$0xf0] }
  0xb2   :  { %1758 = vmatpush.bf16.msra.mxu2 %v3179_v60  ;;  %1772 = vmatpush.bf16.msra.mxu3 %v3307_v1  ;;  %v2972_v60 = vld [vmem:[#allocation5 + $0x2b8] sm:$0xf0]  ;;  %v3466_v1 = vld [vmem:[#allocation5 + $0x688] sm:$0xf]  ;;  %v2639_v8 = vor.u32 %v3848_v56, %v2636_v58  ;;  %v3988_v56 = vld [vmem:[#allocation5 + $0x46c] sm:$0xf] }
  0xb3   :  { %1731 = vmatpush.bf16.msra.mxu0 %v2907_v7  ;;  %v2975_v4 = vor.u32 %v3932_v59, %v2972_v60  ;;  %v2828_v7 = vld [vmem:[#allocation5 + $0x198] sm:$0xf0]  ;;  %v3880_v59 = vld [vmem:[#allocation5 + $0x10c] sm:$0xf] }
  0xb4   :  { %1745 = vmatpush.bf16.msra.mxu1 %v3035_v10  ;;  %v3467_v10 = vor.u32 %v4058_v2, %v3466_v1  ;;  %v2831_v13 = vor.u32 %v3896_v6, %v2828_v7  ;;  %v3972_v1 = vld [vmem:[#allocation5 + $0x3ec] sm:$0xf]  ;;  %v3132_v2 = vld [vmem:[#allocation5 + $0x3f8] sm:$0xf0] }
  0xb5   :  { %v4036_v6 = vld [vmem:[#allocation5 + $0x5ec] sm:$0xf]  ;;  %v3388_v7 = vld [vmem:[#allocation5 + $0x5f8] sm:$0xf0] }
  0xb6   :  { %1759 = vmatpush.bf16.msra.mxu2 %v3163_v12  ;;  %1773 = vmatpush.bf16.msra.mxu3 %v3291_v16  ;;  %v2703_v12 = vor.u32 %v3864_v3, %v2700_v5  ;;  %v3860_v16 = vld [vmem:[#allocation5 + $0x6c] sm:$0xf]  ;;  %v3260_v5 = vld [vmem:[#allocation5 + $0x4f8] sm:$0xf0] }
  0xb7   :  { %1732 = vmatpush.bf16.msra.mxu0 %v2891_v24  ;;  %v3451_v24 = vor.u32 %v4054_v15, %v3450_v14  ;;  %v2687_v25 = vor.u32 %v3860_v16, %v2684_v18  ;;  %v4004_v3 = vld [vmem:[#allocation5 + $0x4ec] sm:$0xf]  ;;  %v3135_v14 = vor.u32 %v3972_v1, %v3132_v2  ;;  %v3391_v16 = vor.u32 %v4036_v6, %v3388_v7  ;;  %v3116_v18 = vld [vmem:[#allocation5 + $0x3d8] sm:$0xf0] }
  0xb8   :  { %1746 = vmatpush.bf16.msra.mxu1 %v3019_v28  ;;  %v4050_v28 = vld [vmem:[#allocation5 + $0x654] sm:$0xf0]  ;;  %v3263_v15 = vor.u32 %v4004_v3, %v3260_v5  ;;  %v3452_v1 = vld [vmem:[#allocation5 + $0x678] sm:$0xf0]  ;;  %v4430_v2 = vpop.f32.mrf.mxu1  ;;  %v3952_v6 = vld [vmem:[#allocation5 + $0x34c] sm:$0xf] }
  0xb9   :  { %v3435_v36 = vor.u32 %v4050_v28, %v3434_v27  ;;  %v3247_v28 = vor.u32 %v4000_v19, %v3244_v21  ;;  %v3052_v7 = vld [vmem:[#allocation5 + $0x358] sm:$0xf0]  ;;  %v3948_v19 = vld [vmem:[#allocation5 + $0x32c] sm:$0xf] }
  0xba   :  { %1760 = vmatpush.bf16.msra.mxu2 %v3147_v29  ;;  %1774 = vmatpush.bf16.msra.mxu3 %v3275_v32  ;;  %v3856_v29 = vld [vmem:[#allocation5 + $0x4c] sm:$0xf] }
  0xbb   :  { %1781 = vmatpush.bf16.msrb.mxu0 %v3515_v33  ;;  %1747 = vmatmul.bf16.vlgmr.msra.gmra.mxu1 %v4399_v23  ;;  %v3888_v32 = vld [vmem:[#allocation5 + $0x14c] sm:$0xf]  ;;  %v2796_v33 = vld [vmem:[#allocation5 + $0x158] sm:$0xf0]  ;;  %v2671_v38 = vor.u32 %v3856_v29, %v2668_v31 }
  0xbc   :  { %1795 = vmatpush.bf16.msrb.mxu1 %v2751_v34  ;;  %1733 = vmatmul.bf16.vlgmr.msra.gmra.mxu0 %v4392_v0  ;;  %v3920_v34 = vld [vmem:[#allocation5 + $0x24c] sm:$0xf]  ;;  %v2799_v39 = vor.u32 %v3888_v32, %v2796_v33  ;;  %v3100_v31 = vld [vmem:[#allocation5 + $0x3b8] sm:$0xf0] }
  0xbd   :  { %1761 = vmatmul.bf16.vlgmr.msra.gmra.mxu2 %v4402_v37  ;;  %1775 = vmatmul.bf16.vlgmr.msra.gmra.mxu3 %v4406_v42  ;;  %v3996_v32 = vld [vmem:[#allocation5 + $0x4ac] sm:$0xf] }
  0xbe   :  { %1809 = vmatpush.bf16.msrb.mxu2 %v2879_v35  ;;  %1823 = vmatpush.bf16.msrb.mxu3 %v3007_v40  ;;  %v2924_v35 = vld [vmem:[#allocation5 + $0x258] sm:$0xf0]  ;;  %v3418_v40 = vld [vmem:[#allocation5 + $0x628] sm:$0xf]  ;;  %v3980_v21 = vld [vmem:[#allocation5 + $0x42c] sm:$0xf] }
  0xbf   :  { %1782 = vmatpush.bf16.msrb.mxu0 %v3499_v48  ;;  %v2927_v45 = vor.u32 %v3920_v34, %v2924_v35  ;;  %v2780_v48 = vld [vmem:[#allocation5 + $0x138] sm:$0xf0]  ;;  %v3419_v51 = vor.u32 %v4046_v43, %v3418_v40  ;;  %v4028_v35 = vld [vmem:[#allocation5 + $0x5ac] sm:$0xf] }
  0xc0   :  { %1796 = vmatpush.bf16.msrb.mxu1 %v2735_v49  ;;  %v3916_v49 = vld [vmem:[#allocation5 + $0x22c] sm:$0xf]  ;;  %v2783_v55 = vor.u32 %v3884_v47, %v2780_v48  ;;  %v3228_v34 = vld [vmem:[#allocation5 + $0x4b8] sm:$0xf0] }
  0xc1   :  { %v3231_v43 = vor.u32 %v3996_v32, %v3228_v34  ;;  %v3992_v47 = vld [vmem:[#allocation5 + $0x48c] sm:$0xf] }
  0xc2   :  { %1810 = vmatpush.bf16.msrb.mxu2 %v2863_v50  ;;  %1824 = vmatpush.bf16.msrb.mxu3 %v2991_v54  ;;  %v2908_v50 = vld [vmem:[#allocation5 + $0x238] sm:$0xf0]  ;;  %v2655_v54 = vor.u32 %v3852_v44, %v2652_v46  ;;  %v3944_v32 = vld [vmem:[#allocation5 + $0x30c] sm:$0xf] }
  0xc3   :  { %1783 = vmatpush.bf16.msrb.mxu0 %v3483_v61  ;;  %v2911_v60 = vor.u32 %v3916_v49, %v2908_v50  ;;  %v2764_v61 = vld [vmem:[#allocation5 + $0x118] sm:$0xf0]  ;;  %v4024_v50 = vld [vmem:[#allocation5 + $0x58c] sm:$0xf] }
  0xc4   :  { %1797 = vmatpush.bf16.msrb.mxu1 %v2719_v62  ;;  %v3912_v62 = vld [vmem:[#allocation5 + $0x20c] sm:$0xf]  ;;  %v2767_v9 = vor.u32 %v3880_v59, %v2764_v61  ;;  %v3084_v46 = vld [vmem:[#allocation5 + $0x398] sm:$0xf0] }
  0xc5   :  { %v3212_v49 = vld [vmem:[#allocation5 + $0x498] sm:$0xf0] }
  0xc6   :  { %1811 = vmatpush.bf16.msrb.mxu2 %v2847_v63  ;;  %1825 = vmatpush.bf16.msrb.mxu3 %v2975_v4  ;;  %v2892_v63 = vld [vmem:[#allocation5 + $0x218] sm:$0xf0]  ;;  %v3403_v4 = vor.u32 %v4042_v53, %v3402_v52  ;;  %v3215_v53 = vor.u32 %v3992_v47, %v3212_v49  ;;  %v3578_v49 = vld [vmem:[#allocation8 + $0x70] sm:$0xf] }
  0xc7   :  { %1784 = vmatpush.bf16.msrb.mxu0 %v3467_v10  ;;  %v4068_v10 = vld [vmem:[#allocation5 + $0x6ec] sm:$0xf]  ;;  %v3468_v52 = vld [vmem:[#allocation5 + $0x698] sm:$0xf0] }
  0xc8   :  { %1798 = vmatpush.bf16.msrb.mxu1 %v2703_v12  ;;  %v3516_v12 = vld [vmem:[#allocation5 + $0x6f8] sm:$0xf0] }
  0xc9   :  { %v3519_v20 = vor.u32 %v4068_v10, %v3516_v12  ;;  %v3196_v59 = vld [vmem:[#allocation5 + $0x478] sm:$0xf0]  ;;  %v4016_v12 = vld [vmem:[#allocation5 + $0x54c] sm:$0xf] }
  0xca   :  { %1812 = vmatpush.bf16.msrb.mxu2 %v2831_v13  ;;  %1826 = vmatpush.bf16.msrb.mxu3 %v2959_v17  ;;  %v2895_v13 = vor.u32 %v3912_v62, %v2892_v63  ;;  %v3968_v17 = vld [vmem:[#allocation5 + $0x3cc] sm:$0xf]  ;;  %v3324_v61 = vld [vmem:[#allocation5 + $0x578] sm:$0xf0]  ;;  %v4428_v62 = vpop.f32.mrf.mxu0 }
  0xcb   :  { %1785 = vmatpush.bf16.msrb.mxu0 %v3451_v24  ;;  %v3372_v24 = vld [vmem:[#allocation5 + $0x5d8] sm:$0xf0]  ;;  %v3119_v27 = vor.u32 %v3968_v17, %v3116_v18  ;;  %v4052_v63 = vld [vmem:[#allocation5 + $0x66c] sm:$0xf]  ;;  %v4436_v47 = vpop.f32.mrf.mxu3 }
  0xcc   :  { %1799 = vmatpush.bf16.msrb.mxu1 %v2687_v25  ;;  %v4064_v25 = vld [vmem:[#allocation5 + $0x6cc] sm:$0xf]  ;;  %v3375_v29 = vor.u32 %v4032_v22, %v3372_v24  ;;  %v3180_v10 = vld [vmem:[#allocation5 + $0x458] sm:$0xf0]  ;;  %v4432_v22 = vpop.f32.mrf.mxu2 }
  0xce   :  { %1813 = vmatpush.bf16.msrb.mxu2 %v2815_v26  ;;  %1827 = vmatpush.bf16.msrb.mxu3 %v2943_v30  ;;  %v3500_v26 = vld [vmem:[#allocation5 + $0x6d8] sm:$0xf0]  ;;  %v3964_v30 = vld [vmem:[#allocation5 + $0x3ac] sm:$0xf] }
  0xcf   :  { %1786 = vmatpush.bf16.msrb.mxu0 %v3435_v36  ;;  %v3503_v33 = vor.u32 %v4064_v25, %v3500_v26  ;;  %v3356_v36 = vld [vmem:[#allocation5 + $0x5b8] sm:$0xf0]  ;;  %v3103_v40 = vor.u32 %v3964_v30, %v3100_v31  ;;  %v4012_v26 = vld [vmem:[#allocation5 + $0x52c] sm:$0xf]  ;;  %v4434_v30 = vld [vmem:[#allocation7] sm:$0xf] }
  0xd0   :  { %1800 = vmatpush.bf16.msrb.mxu1 %v2671_v38  ;;  %v4060_v38 = vld [vmem:[#allocation5 + $0x6ac] sm:$0xf]  ;;  %v3359_v44 = vor.u32 %v4028_v35, %v3356_v36  ;;  %v3164_v25 = vld [vmem:[#allocation5 + $0x438] sm:$0xf0] }
  0xd1   :  { %v3167_v34 = vor.u32 %v3980_v21, %v3164_v25  ;;  %v3020_v36 = vld [vmem:[#allocation5 + $0x318] sm:$0xf0] }
  0xd2   :  { %1814 = vmatpush.bf16.msrb.mxu2 %v2799_v39  ;;  %1828 = vmatpush.bf16.msrb.mxu3 %v2927_v45  ;;  %v3484_v39 = vld [vmem:[#allocation5 + $0x6b8] sm:$0xf0]  ;;  %v3960_v45 = vld [vmem:[#allocation5 + $0x38c] sm:$0xf] }
  0xd3   :  { %1787 = vmatpush.bf16.msrb.mxu0 %v3419_v51  ;;  %v3487_v48 = vor.u32 %v4060_v38, %v3484_v39  ;;  %v4056_v51 = vld [vmem:[#allocation5 + $0x68c] sm:$0xf]  ;;  %v3148_v39 = vld [vmem:[#allocation5 + $0x418] sm:$0xf0] }
  0xd4   :  { %1801 = vmatpush.bf16.msrb.mxu1 %v2655_v54  ;;  %v3956_v54 = vld [vmem:[#allocation5 + $0x36c] sm:$0xf]  ;;  %v3471_v58 = vor.u32 %v4056_v51, %v3468_v52  ;;  %v3642_v51 = vld [vmem:[#allocation8 + $0xf0] sm:$0xf]  ;;  %v4102_v52 = vld [vmem:[#allocation8 + $0xf4] sm:$0xf0] }
  0xd5   :  { %v3976_v38 = vld [vmem:[#allocation5 + $0x40c] sm:$0xf] }
  0xd6   :  { %1815 = vmatpush.bf16.msrb.mxu2 %v2783_v55  ;;  %1829 = vmatpush.bf16.msrb.mxu3 %v2911_v60  ;;  %v3068_v55 = vld [vmem:[#allocation5 + $0x378] sm:$0xf0]  ;;  %v4020_v60 = vld [vmem:[#allocation5 + $0x56c] sm:$0xf] }
  0xd7   :  { %1788 = vmatpush.bf16.msrb.mxu0 %v3403_v4  ;;  %v3071_v3 = vor.u32 %v3956_v54, %v3068_v55  ;;  %v3199_v4 = vor.u32 %v3988_v56, %v3196_v59  ;;  %v3327_v5 = vor.u32 %v4020_v60, %v3324_v61  ;;  %v3570_v56 = vld [vmem:[#allocation8 + $0x60] sm:$0xf]  ;;  %v3643_v59 = vor.u32 %v4102_v52, %v3642_v51  ;;  %v1540_v60 = vpop.f32.mrf.mxu2 }
  0xd8   :  { %1802 = vmatpush.bf16.msrb.mxu1 %v2639_v8  ;;  %v3984_v8 = vld [vmem:[#allocation5 + $0x44c] sm:$0xf]  ;;  %v3634_v61 = vld [vmem:[#allocation8 + $0xe0] sm:$0xf]  ;;  %v338_v52 = vperm.slane %v4434_v30, 1 }
  0xd9   :  { %v3183_v17 = vor.u32 %v3984_v8, %v3180_v10  ;;  %v3626_v10 = vld [vmem:[#allocation8 + $0xd0] sm:$0xf] }
  0xda   :  { %1816 = vmatpush.bf16.msrb.mxu2 %v2767_v9  ;;  %1830 = vmatpush.bf16.msrb.mxu3 %v2895_v13  ;;  %v3455_v9 = vor.u32 %v4052_v63, %v3452_v1  ;;  %v3308_v13 = vld [vmem:[#allocation5 + $0x558] sm:$0xf0]  ;;  %v4100_v63 = vld [vmem:[#allocation8 + $0xe4] sm:$0xf0] }
  0xdb   :  { %1837 = vmatpush.bf16.msra.mxu0 %v3135_v14  ;;  %1803 = vmatmul.bf16.vlgmr.msrb.gmra.mxu1 %v4390_v57  ;;  %v4048_v14 = vld [vmem:[#allocation5 + $0x64c] sm:$0xf]  ;;  %v3311_v18 = vor.u32 %v4016_v12, %v3308_v13  ;;  %v3635_v8 = vor.u32 %v4100_v63, %v3634_v61  ;;  %v3586_v61 = vld [vmem:[#allocation8 + $0x80] sm:$0xf] }
  0xdc   :  { %1851 = vmatpush.bf16.msra.mxu1 %v3263_v15  ;;  %1789 = vmatmul.bf16.vlgmr.msrb.gmra.mxu0 %v4404_v41  ;;  %v3436_v15 = vld [vmem:[#allocation5 + $0x658] sm:$0xf0]  ;;  %v4088_v63 = vld [vmem:[#allocation8 + $0x84] sm:$0xf0] }
  0xdd   :  { %1817 = vmatmul.bf16.vlgmr.msrb.gmra.mxu2 %v4396_v11  ;;  %1831 = vmatmul.bf16.vlgmr.msrb.gmra.mxu3 %v4392_v0  ;;  %v3340_v11 = vld [vmem:[#allocation5 + $0x598] sm:$0xf0]  ;;  %v3087_v0 = vor.u32 %v3960_v45, %v3084_v46  ;;  %v3439_v24 = vor.u32 %v4048_v14, %v3436_v15  ;;  %v4040_v46 = vld [vmem:[#allocation5 + $0x60c] sm:$0xf]  ;;  %v1554_v14 = vpop.f32.mrf.mxu3 }
  0xde   :  { %1865 = vmatpush.bf16.msra.mxu2 %v3391_v16  ;;  %1879 = vmatpush.bf16.msra.mxu3 %v3519_v20  ;;  %v3343_v57 = vor.u32 %v4024_v50, %v3340_v11  ;;  %v3055_v16 = vor.u32 %v3952_v6, %v3052_v7  ;;  %v3036_v20 = vld [vmem:[#allocation5 + $0x338] sm:$0xf0]  ;;  %v3023_v11 = vor.u32 %v3944_v32, %v3020_v36  ;;  %v3562_v6 = vld [vmem:[#allocation8 + $0x50] sm:$0xf]  ;;  %v3602_v36 = vld [vmem:[#allocation8 + $0xa0] sm:$0xf] }
  0xdf   :  { %1838 = vmatpush.bf16.msra.mxu0 %v3119_v27  ;;  %v3292_v27 = vld [vmem:[#allocation5 + $0x538] sm:$0xf0]  ;;  %v3039_v31 = vor.u32 %v3948_v19, %v3036_v20  ;;  %v4096_v19 = vld [vmem:[#allocation8 + $0xc4] sm:$0xf0] }
  0xe0   :  { %1852 = vmatpush.bf16.msra.mxu1 %v3247_v28  ;;  %v4044_v28 = vld [vmem:[#allocation5 + $0x62c] sm:$0xf]  ;;  %v3295_v35 = vor.u32 %v4012_v26, %v3292_v27  ;;  %v3276_v45 = vld [vmem:[#allocation5 + $0x518] sm:$0xf0]  ;;  %v3610_v26 = vld [vmem:[#allocation8 + $0xb0] sm:$0xf] }
  0xe1   :  { %v4086_v50 = vld [vmem:[#allocation8 + $0x74] sm:$0xf0] }
  0xe2   :  { %1866 = vmatpush.bf16.msra.mxu2 %v3375_v29  ;;  %1880 = vmatpush.bf16.msra.mxu3 %v3503_v33  ;;  %v3420_v29 = vld [vmem:[#allocation5 + $0x638] sm:$0xf0]  ;;  %v1512_v33 = vpop.f32.mrf.mxu0  ;;  %v3579_v55 = vor.u32 %v4086_v50, %v3578_v49 }
  0xe3   :  { %1839 = vmatpush.bf16.msra.mxu0 %v3103_v40  ;;  %v1526_v40 = vpop.f32.mrf.mxu1  ;;  %v4082_v7 = vld [vmem:[#allocation8 + $0x54] sm:$0xf0] }
  0xe4   :  { %1853 = vmatpush.bf16.msra.mxu1 %v3231_v43  ;;  %v3423_v43 = vor.u32 %v4044_v28, %v3420_v29  ;;  %v3563_v15 = vor.u32 %v4082_v7, %v3562_v6  ;;  %v4090_v49 = vld [vmem:[#allocation8 + $0x94] sm:$0xf0] }
  0xe6   :  { %1867 = vmatpush.bf16.msra.mxu2 %v3359_v44  ;;  %1881 = vmatpush.bf16.msra.mxu3 %v3487_v48  ;;  %v4008_v44 = vld [vmem:[#allocation5 + $0x50c] sm:$0xf]  ;;  %v3404_v48 = vld [vmem:[#allocation5 + $0x618] sm:$0xf0] }
  0xe7   :  { %1840 = vmatpush.bf16.msra.mxu0 %v3087_v0  ;;  %v337_v0 = vperm.slane %v4434_v30, 0  ;;  %v3407_v54 = vor.u32 %v4040_v46, %v3404_v48  ;;  %v3594_v48 = vld [vmem:[#allocation8 + $0x90] sm:$0xf] }
  0xe8   :  { %1854 = vmatpush.bf16.msra.mxu1 %v3215_v53  ;;  %v3151_v53 = vor.u32 %v3976_v38, %v3148_v39  ;;  %v4092_v38 = vld [vmem:[#allocation8 + $0xa4] sm:$0xf0] }
  0xe9   :  { %v1511_v1 = vadd.f32 %v4428_v62, %v337_v0  ;;  %v4098_v62 = vld [vmem:[#allocation8 + $0xd4] sm:$0xf0]  ;;  %v3603_v46 = vor.u32 %v4092_v38, %v3602_v36 }
  0xea   :  { %1868 = vmatpush.bf16.msra.mxu2 %v3343_v57  ;;  %1882 = vmatpush.bf16.msra.mxu3 %v3471_v58  ;;  %v3279_v57 = vor.u32 %v4008_v44, %v3276_v45  ;;  %v4084_v58 = vld [vmem:[#allocation8 + $0x64] sm:$0xf0]  ;;  %v3530_v44 = vld [vmem:[#allocation8 + $0x10] sm:$0xf]  ;;  %v4074_v45 = vld [vmem:[#allocation8 + $0x14] sm:$0xf0] }
  0xeb   :  { %1841 = vmatpush.bf16.msra.mxu0 %v3071_v3  ;;  %v1513_v3 = vadd.f32 %v1512_v33, %v337_v0  ;;  %v1525_v12 = vadd.f32 %v4430_v2, %v1511_v1  ;;  %v4078_v2 = vld [vmem:[#allocation8 + $0x34] sm:$0xf0] }
  0xec   :  { %1855 = vmatpush.bf16.msra.mxu1 %v3199_v4  ;;  %v3571_v4 = vor.u32 %v4084_v58, %v3570_v56  ;;  %v4072_v56 = vld [vmem:[#allocation8 + $0x4] sm:$0xf0]  ;;  %v4085_v58 = vld [vmem:[#allocation8 + $0x74] sm:$0xf] }
  0xed   :  { %v1527_v13 = vadd.f32 %v1526_v40, %v1513_v3  ;;  %v4101_v3 = vld [vmem:[#allocation8 + $0xf4] sm:$0xf] }
  0xee   :  { %1869 = vmatpush.bf16.msra.mxu2 %v3327_v5  ;;  %1883 = vmatpush.bf16.msra.mxu3 %v3455_v9  ;;  %v1566_v5 = vpop.f32.mrf.mxu0  ;;  %v1580_v9 = vpop.f32.mrf.mxu1 }
  0xef   :  { %1842 = vmatpush.bf16.msra.mxu0 %v3055_v16  ;;  %v4080_v16 = vld [vmem:[#allocation8 + $0x44] sm:$0xf0]  ;;  %v1541_v20 = vadd.f32 %v1540_v60, %v1527_v13  ;;  %v3580_v60 = vld [vmem:[#allocation8 + $0x78] sm:$0xf0] }
  0xf0   :  { %1856 = vmatpush.bf16.msra.mxu1 %v3183_v17  ;;  %v3627_v17 = vor.u32 %v4098_v62, %v3626_v10  ;;  %v4083_v10 = vld [vmem:[#allocation8 + $0x64] sm:$0xf]  ;;  %v3572_v62 = vld [vmem:[#allocation8 + $0x68] sm:$0xf0] }
  0xf1   :  { %v1555_v28 = vadd.f32 %v1554_v14, %v1541_v20 }
  0xf2   :  { %1870 = vmatpush.bf16.msra.mxu2 %v3311_v18  ;;  %1884 = vmatpush.bf16.msra.mxu3 %v3439_v24  ;;  %v3618_v18 = vld [vmem:[#allocation8 + $0xc0] sm:$0xf]  ;;  %v3546_v24 = vld [vmem:[#allocation8 + $0x30] sm:$0xf] }
  0xf3   :  { %1843 = vmatpush.bf16.msra.mxu0 %v3039_v31  ;;  %v3619_v25 = vor.u32 %v4096_v19, %v3618_v18  ;;  %v1608_v31 = vpop.f32.mrf.mxu3  ;;  %v3547_v33 = vor.u32 %v4078_v2, %v3546_v24  ;;  %v3575_v19 = vor.u32 %v4083_v10, %v3572_v62  ;;  %v3532_v62 = vld [vmem:[#allocation8 + $0x18] sm:$0xf0] }
  0xf4   :  { %1857 = vmatpush.bf16.msra.mxu1 %v3167_v34  ;;  %v3538_v34 = vld [vmem:[#allocation8 + $0x20] sm:$0xf] }
  0xf6   :  { %1871 = vmatpush.bf16.msra.mxu2 %v3295_v35  ;;  %1885 = vmatpush.bf16.msra.mxu3 %v3423_v43  ;;  %v1568_v29 = vpop.f32.mrf.mxu0  ;;  %v1582_v32 = vpop.f32.mrf.mxu1 }
  0xf7   :  { %1844 = vmatpush.bf16.msra.mxu0 %v3023_v11  ;;  %v1569_v40 = vadd.f32 %v1568_v29, %v1555_v28  ;;  %v4079_v29 = vld [vmem:[#allocation8 + $0x44] sm:$0xf] }
  0xf8   :  { %1858 = vmatpush.bf16.msra.mxu1 %v3151_v53  ;;  %v3531_v53 = vor.u32 %v4074_v45, %v3530_v44  ;;  %v4077_v44 = vld [vmem:[#allocation8 + $0x34] sm:$0xf] }
  0xf9   :  { %v1583_v11 = vadd.f32 %v1582_v32, %v1569_v40 }
  0xfa   :  { %1872 = vmatpush.bf16.msra.mxu2 %v3279_v57  ;;  %1886 = vmatpush.bf16.msra.mxu3 %v3407_v54 }
  0xfb   :  { %2295 = vmatpush.bf16.msrb.mxu0 %v3579_v55  ;;  %1859 = vmatmul.bf16.vlgmr.msra.gmra.mxu1 %v4402_v37  ;;  %v1539_v37 = vadd.f32 %v4432_v22, %v1525_v12  ;;  %v4076_v22 = vld [vmem:[#allocation8 + $0x24] sm:$0xf0]  ;;  %v1610_v54 = vpop.f32.mrf.mxu3  ;;  %v3522_v55 = vld [vmem:[#allocation8] sm:$0xf] }
  0xfc   :  { %1845 = vmatmul.bf16.vlgmr.msra.gmra.mxu0 %v4399_v23  ;;  %2309 = vmatpush.bf16.msrb.mxu1 %v3643_v59  ;;  %v3554_v23 = vld [vmem:[#allocation8 + $0x40] sm:$0xf]  ;;  %v3539_v43 = vor.u32 %v4076_v22, %v3538_v34  ;;  %v3595_v59 = vor.u32 %v4090_v49, %v3594_v48  ;;  %v3523_v6 = vor.u32 %v4072_v56, %v3522_v55  ;;  %v3620_v34 = vld [vmem:[#allocation8 + $0xc8] sm:$0xf0]  ;;  %v3706_v22 = vld [vmem:[#allocation8 + $0x170] sm:$0xf] }
  0xfd   :  { %1873 = vmatmul.bf16.vlgmr.msra.gmra.mxu2 %v4406_v42  ;;  %1887 = vmatmul.bf16.vlgmr.msra.gmra.mxu3 %v4404_v41  ;;  %v1594_v42 = vpop.f32.mrf.mxu2  ;;  %v3555_v21 = vor.u32 %v4080_v16, %v3554_v23  ;;  %v4094_v41 = vld [vmem:[#allocation8 + $0xb4] sm:$0xf0]  ;;  %v1553_v27 = vadd.f32 %v4436_v47, %v1539_v37  ;;  %v3636_v23 = vld [vmem:[#allocation8 + $0xe8] sm:$0xf0]  ;;  %v1611_v37 = vadd.f32 %v1610_v54, %v338_v52  ;;  %v3698_v49 = vld [vmem:[#allocation8 + $0x160] sm:$0xf] }
  0xfe   :  { %v3611_v35 = vor.u32 %v4094_v41, %v3610_v26  ;;  %v1622_v51 = vpop.f32.mrf.mxu0  ;;  %v1636_v0 = vpop.f32.mrf.mxu1  ;;  %v3628_v26 = vld [vmem:[#allocation8 + $0xd8] sm:$0xf0]  ;;  %v4075_v56 = vld [vmem:[#allocation8 + $0x24] sm:$0xf] }
  0xff   :  { %2296 = vmatpush.bf16.msrb.mxu0 %v3571_v4  ;;  %v1567_v39 = vadd.f32 %v1566_v5, %v1553_v27  ;;  %v3644_v4 = vld [vmem:[#allocation8 + $0xf8] sm:$0xf0]  ;;  %v1609_v5 = vadd.f32 %v1608_v31, %v338_v52  ;;  %v3556_v31 = vld [vmem:[#allocation8 + $0x48] sm:$0xf0] }
 0x100   :  { %2310 = vmatpush.bf16.msrb.mxu1 %v3635_v8  ;;  %v3583_v8 = vor.u32 %v4085_v58, %v3580_v60  ;;  %v3647_v12 = vor.u32 %v4101_v3, %v3644_v4  ;;  %v3540_v58 = vld [vmem:[#allocation8 + $0x28] sm:$0xf0]  ;;  %v4091_v60 = vld [vmem:[#allocation8 + $0xa4] sm:$0xf] }
 0x101   :  { %v1581_v50 = vadd.f32 %v1580_v9, %v1567_v39  ;;  %v3587_v9 = vor.u32 %v4088_v63, %v3586_v61  ;;  %v1623_v16 = vadd.f32 %v1622_v51, %v1609_v5  ;;  %v3612_v51 = vld [vmem:[#allocation8 + $0xb8] sm:$0xf0]  ;;  %v3604_v61 = vld [vmem:[#allocation8 + $0xa8] sm:$0xf0]  ;;  %v3690_v63 = vld [vmem:[#allocation8 + $0x150] sm:$0xf] }
 0x103   :  { %2297 = vmatpush.bf16.msrb.mxu0 %v3563_v15  ;;  %v1595_v1 = vadd.f32 %v1594_v42, %v1581_v50  ;;  %v4099_v15 = vld [vmem:[#allocation8 + $0xe4] sm:$0xf]  ;;  %v4081_v42 = vld [vmem:[#allocation8 + $0x54] sm:$0xf]  ;;  %v1664_v2 = vpop.f32.mrf.mxu3  ;;  %v1637_v41 = vadd.f32 %v1636_v0, %v1623_v16  ;;  %v4116_v50 = vld [vmem:[#allocation8 + $0x164] sm:$0xf0] }
 0x104   :  { %2311 = vmatpush.bf16.msrb.mxu1 %v3627_v17  ;;  %v3639_v24 = vor.u32 %v4099_v15, %v3636_v23  ;;  %v3699_v52 = vor.u32 %v4116_v50, %v3698_v49  ;;  %v4089_v16 = vld [vmem:[#allocation8 + $0x94] sm:$0xf] }
 0x105   :  { %v1596_v47 = vpop.f32.mrf.mxu2  ;;  %v1893_v13 = vmax.f32 %v1595_v1, 0.0  ;;  %v4114_v1 = vld [vmem:[#allocation8 + $0x154] sm:$0xf0] }
 0x106   :  { %v1597_v57 = vadd.f32 %v1596_v47, %v1583_v11  ;;  %v1624_v18 = vpop.f32.mrf.mxu0  ;;  %v1638_v20 = vpop.f32.mrf.mxu1  ;;  %v3548_v47 = vld [vmem:[#allocation8 + $0x38] sm:$0xf0]  ;;  %v4093_v11 = vld [vmem:[#allocation8 + $0xb4] sm:$0xf]  ;;  %v3691_v4 = vor.u32 %v4114_v1, %v3690_v63  ;;  %v3754_v1 = vld [vmem:[#allocation8 + $0x1d0] sm:$0xf] }
 0x107   :  { %2298 = vmatpush.bf16.msrb.mxu0 %v3555_v21  ;;  %v3564_v21 = vld [vmem:[#allocation8 + $0x58] sm:$0xf0]  ;;  %v1625_v28 = vadd.f32 %v1624_v18, %v1611_v37  ;;  %v3551_v54 = vor.u32 %v4077_v44, %v3548_v47  ;;  %v4115_v47 = vld [vmem:[#allocation8 + $0x164] sm:$0xf] }
 0x108   :  { %2312 = vmatpush.bf16.msrb.mxu1 %v3619_v25  ;;  %v1897_v7 = vmax.f32 %v1597_v57, 0.0  ;;  %v4097_v25 = vld [vmem:[#allocation8 + $0xd4] sm:$0xf]  ;;  %v3567_v27 = vor.u32 %v4081_v42, %v3564_v21  ;;  %v3596_v18 = vld [vmem:[#allocation8 + $0x98] sm:$0xf0] }
 0x109   :  { %v3631_v32 = vor.u32 %v4097_v25, %v3628_v26  ;;  %v1639_v45 = vadd.f32 %v1638_v20, %v1625_v28  ;;  %v4071_v42 = vld [vmem:[#allocation8 + $0x4] sm:$0xf]  ;;  %v3524_v21 = vld [vmem:[#allocation8 + $0x8] sm:$0xf0]  ;;  %v4110_v25 = vld [vmem:[#allocation8 + $0x134] sm:$0xf0] }
 0x10a   :  { %v4448_v17 = vpack.c.bf16 %v1897_v7, %v1893_v13  ;;  %v4073_v7 = vld [vmem:[#allocation8 + $0x14] sm:$0xf]  ;;  %v3682_v13 = vld [vmem:[#allocation8 + $0x140] sm:$0xf]  ;;  %v3708_v44 = vld [vmem:[#allocation8 + $0x178] sm:$0xf0] }
 0x10b   :  { %2299 = vmatpush.bf16.msrb.mxu0 %v3547_v33  ;;  %v4095_v33 = vld [vmem:[#allocation8 + $0xc4] sm:$0xf]  ;;  %v1666_v57 = vpop.f32.mrf.mxu3 }
 0x10c   :  { %2313 = vmatpush.bf16.msrb.mxu1 %v3611_v35  ;;  %v4118_v35 = vld [vmem:[#allocation8 + $0x174] sm:$0xf0]  ;;  %v3623_v48 = vor.u32 %v4095_v33, %v3620_v34 }
 0x10d   :  { %v1650_v14 = vpop.f32.mrf.mxu2  ;;  %v3707_v38 = vor.u32 %v4118_v35, %v3706_v22  ;;  %v3658_v22 = vld [vmem:[#allocation8 + $0x110] sm:$0xf]  ;;  %v4106_v35 = vld [vmem:[#allocation8 + $0x114] sm:$0xf0] }
 0x10e   :  { %v1651_v36 = vadd.f32 %v1650_v14, %v1637_v41  ;;  %v4112_v14 = vld [vmem:[#allocation8 + $0x144] sm:$0xf0]  ;;  %v4087_v41 = vld [vmem:[#allocation8 + $0x84] sm:$0xf] }
 0x10f   :  { %2300 = vmatpush.bf16.msrb.mxu0 %v3539_v43  ;;  %v3559_v43 = vor.u32 %v4079_v29, %v3556_v31  ;;  %2323 = vmatpush.bf16.msrb.mxu2 %v3707_v38  ;;  %v3683_v15 = vor.u32 %v4112_v14, %v3682_v13  ;;  %v3527_v29 = vor.u32 %v4071_v42, %v3524_v21  ;;  %v3666_v31 = vld [vmem:[#allocation8 + $0x120] sm:$0xf]  ;;  %v3668_v13 = vld [vmem:[#allocation8 + $0x128] sm:$0xf0] }
 0x110   :  { %2314 = vmatpush.bf16.msrb.mxu1 %v3603_v46  ;;  %v1665_v0 = vadd.f32 %v1664_v2, %v1651_v36  ;;  %v3674_v2 = vld [vmem:[#allocation8 + $0x130] sm:$0xf]  ;;  %v3659_v36 = vor.u32 %v4106_v35, %v3658_v22  ;;  %v3650_v38 = vld [vmem:[#allocation8 + $0x100] sm:$0xf] }
 0x111   :  { %v3675_v28 = vor.u32 %v4110_v25, %v3674_v2  ;;  %v3730_v25 = vld [vmem:[#allocation8 + $0x1a0] sm:$0xf] }
 0x113   :  { %2301 = vmatpush.bf16.msrb.mxu0 %v3531_v53  ;;  %2324 = vmatpush.bf16.msrb.mxu2 %v3699_v52  ;;  %v4113_v52 = vld [vmem:[#allocation8 + $0x154] sm:$0xf] }
 0x114   :  { %2315 = vmatpush.bf16.msrb.mxu1 %v3595_v59  ;;  %v3615_v59 = vor.u32 %v4093_v11, %v3612_v51  ;;  %v3770_v11 = vld [vmem:[#allocation8 + $0x1f0] sm:$0xf]  ;;  %v4134_v51 = vld [vmem:[#allocation8 + $0x1f4] sm:$0xf0] }
 0x115   :  { %v1652_v39 = vpop.f32.mrf.mxu2 }
 0x116   :  { %v1653_v53 = vadd.f32 %v1652_v39, %v1639_v45  ;;  %v4104_v39 = vld [vmem:[#allocation8 + $0x104] sm:$0xf0] }
 0x117   :  { %2302 = vmatpush.bf16.msrb.mxu0 %v3523_v6  ;;  %v3543_v6 = vor.u32 %v4075_v56, %v3540_v58  ;;  %2325 = vmatpush.bf16.msrb.mxu2 %v3691_v4  ;;  %v4109_v4 = vld [vmem:[#allocation8 + $0x134] sm:$0xf] }
 0x118   :  { %2316 = vmatpush.bf16.msrb.mxu1 %v3587_v9  ;;  %v1692_v46 = vpop.f32.mrf.mxu1  ;;  %v1667_v3 = vadd.f32 %v1666_v57, %v1653_v53  ;;  %v3692_v53 = vld [vmem:[#allocation8 + $0x158] sm:$0xf0]  ;;  %v3762_v57 = vld [vmem:[#allocation8 + $0x1e0] sm:$0xf] }
 0x119   :  { %v1678_v40 = vpop.f32.mrf.mxu0 }
 0x11a   :  { %2303 = vmatmul.bf16.vlgmr.msrb.gmra.mxu0 %v4448_v17  ;;  %v1679_v55 = vadd.f32 %v1678_v40, %v1665_v0  ;;  %v3651_v40 = vor.u32 %v4104_v39, %v3650_v38  ;;  %v3771_v0 = vor.u32 %v4134_v51, %v3770_v11  ;;  %v3722_v38 = vld [vmem:[#allocation8 + $0x190] sm:$0xf]  ;;  %v4122_v39 = vld [vmem:[#allocation8 + $0x194] sm:$0xf0]  ;;  %v4133_v51 = vld [vmem:[#allocation8 + $0x1f4] sm:$0xf] }
 0x11b   :  { %2351 = vmatpush.bf16.msra.mxu0 %v3583_v8  ;;  %2326 = vmatpush.bf16.msrb.mxu2 %v3683_v15 }
 0x11c   :  { %2365 = vmatpush.bf16.msra.mxu1 %v3647_v12  ;;  %v1693_v8 = vadd.f32 %v1692_v46, %v1679_v55  ;;  %v3607_v12 = vor.u32 %v4091_v60, %v3604_v61  ;;  %2337 = vmatpush.bf16.msrb.mxu3 %v3771_v0  ;;  %v4111_v55 = vld [vmem:[#allocation8 + $0x144] sm:$0xf]  ;;  %v339_v60 = vperm.slane %v4434_v30, 2 }
 0x11e   :  { %v1894_v37 = vmax.f32 %v1693_v8, 0.0  ;;  %v3746_v8 = vld [vmem:[#allocation8 + $0x1c0] sm:$0xf] }
 0x11f   :  { %2352 = vmatpush.bf16.msra.mxu0 %v3575_v19  ;;  %v3535_v19 = vor.u32 %v4073_v7, %v3532_v62  ;;  %2327 = vmatpush.bf16.msrb.mxu2 %v3675_v28  ;;  %v3676_v7 = vld [vmem:[#allocation8 + $0x138] sm:$0xf0]  ;;  %v3652_v28 = vld [vmem:[#allocation8 + $0x108] sm:$0xf0] }
 0x120   :  { %2366 = vmatpush.bf16.msra.mxu1 %v3639_v24  ;;  %v1694_v10 = vpop.f32.mrf.mxu1  ;;  %v3599_v24 = vor.u32 %v4089_v16, %v3596_v18  ;;  %v1706_v46 = vpop.f32.mrf.mxu2  ;;  %v3679_v62 = vor.u32 %v4109_v4, %v3676_v7  ;;  %v4126_v16 = vld [vmem:[#allocation8 + $0x1b4] sm:$0xf0]  ;;  %v3748_v7 = vld [vmem:[#allocation8 + $0x1c8] sm:$0xf0] }
 0x121   :  { %v1680_v5 = vpop.f32.mrf.mxu0  ;;  %v1720_v50 = vpop.f32.mrf.mxu3 }
 0x122   :  { %v1681_v9 = vadd.f32 %v1680_v5, %v1667_v3  ;;  %v4130_v3 = vld [vmem:[#allocation8 + $0x1d4] sm:$0xf0] }
 0x123   :  { %2353 = vmatpush.bf16.msra.mxu0 %v3567_v27  ;;  %v3588_v27 = vld [vmem:[#allocation8 + $0x88] sm:$0xf0] }
 0x124   :  { %2367 = vmatpush.bf16.msra.mxu1 %v3631_v32  ;;  %v1695_v23 = vadd.f32 %v1694_v10, %v1681_v9  ;;  %v4108_v32 = vld [vmem:[#allocation8 + $0x124] sm:$0xf0]  ;;  %v3591_v34 = vor.u32 %v4087_v41, %v3588_v27  ;;  %v1707_v10 = vadd.f32 %v1706_v46, %v339_v60  ;;  %v4103_v27 = vld [vmem:[#allocation8 + $0x104] sm:$0xf] }
 0x125   :  { %v3667_v33 = vor.u32 %v4108_v32, %v3666_v31  ;;  %v4128_v9 = vld [vmem:[#allocation8 + $0x1c4] sm:$0xf0] }
 0x126   :  { %v1898_v20 = vmax.f32 %v1695_v23, 0.0  ;;  %v3747_v14 = vor.u32 %v4128_v9, %v3746_v8  ;;  %v3738_v23 = vld [vmem:[#allocation8 + $0x1b0] sm:$0xf] }
 0x127   :  { %2354 = vmatpush.bf16.msra.mxu0 %v3559_v43  ;;  %2328 = vmatpush.bf16.msrb.mxu2 %v3667_v33  ;;  %v4117_v43 = vld [vmem:[#allocation8 + $0x174] sm:$0xf] }
 0x128   :  { %2368 = vmatpush.bf16.msra.mxu1 %v3623_v48  ;;  %v1902_v26 = vpack.c.bf16 %v1898_v20, %v1894_v37  ;;  %v3711_v45 = vor.u32 %v4117_v43, %v3708_v44  ;;  %v3700_v48 = vld [vmem:[#allocation8 + $0x168] sm:$0xf0]  ;;  %v1708_v56 = vpop.f32.mrf.mxu2  ;;  %v3660_v37 = vld [vmem:[#allocation8 + $0x118] sm:$0xf0]  ;;  %v1721_v20 = vadd.f32 %v1720_v50, %v1707_v10  ;;  %v3723_v44 = vor.u32 %v4122_v39, %v3722_v38 }
 0x129   :  { %v3703_v49 = vor.u32 %v4115_v47, %v3700_v48  ;;  %v1722_v5 = vpop.f32.mrf.mxu3  ;;  %v1709_v42 = vadd.f32 %v1708_v56, %v339_v60  ;;  %v3714_v48 = vld [vmem:[#allocation8 + $0x180] sm:$0xf]  ;;  %v3764_v56 = vld [vmem:[#allocation8 + $0x1e8] sm:$0xf0] }
 0x12a   :  { %2317 = vmatmul.bf16.vlgmr.msrb.gmra.mxu1 %v1902_v26 }
 0x12b   :  { %2355 = vmatpush.bf16.msra.mxu0 %v3551_v54  ;;  %2329 = vmatpush.bf16.msrb.mxu2 %v3659_v36  ;;  %v4132_v54 = vld [vmem:[#allocation8 + $0x1e4] sm:$0xf0] }
 0x12c   :  { %2369 = vmatpush.bf16.msra.mxu1 %v3615_v59  ;;  %v3763_v58 = vor.u32 %v4132_v54, %v3762_v57  ;;  %v3684_v59 = vld [vmem:[#allocation8 + $0x148] sm:$0xf0] }
 0x12d   :  { %v3687_v61 = vor.u32 %v4111_v55, %v3684_v59  ;;  %v4131_v55 = vld [vmem:[#allocation8 + $0x1e4] sm:$0xf] }
 0x12e   :  { %2338 = vmatpush.bf16.msrb.mxu3 %v3763_v58  ;;  %v3767_v59 = vor.u32 %v4131_v55, %v3764_v56  ;;  %v4149_v55 = vld [vmem:[#allocation10 + $0x70] sm:$0xff]  ;;  %v4136_v56 = vld [vmem:[#allocation10 + $0x8] sm:$0xff] }
 0x12f   :  { %2356 = vmatpush.bf16.msra.mxu0 %v3543_v6  ;;  %2330 = vmatpush.bf16.msrb.mxu2 %v3651_v40  ;;  %v3755_v6 = vor.u32 %v4130_v3, %v3754_v1  ;;  %v3756_v1 = vld [vmem:[#allocation8 + $0x1d8] sm:$0xf0] }
 0x130   :  { %2370 = vmatpush.bf16.msra.mxu1 %v3607_v12  ;;  %v4107_v12 = vld [vmem:[#allocation8 + $0x124] sm:$0xf] }
 0x131   :  { %v3671_v15 = vor.u32 %v4107_v12, %v3668_v13  ;;  %v3740_v12 = vld [vmem:[#allocation8 + $0x1b8] sm:$0xf0]  ;;  %v340_v13 = vperm.slane %v4434_v30, 3 }
 0x132   :  { %2339 = vmatpush.bf16.msrb.mxu3 %v3755_v6  ;;  %v4127_v6 = vld [vmem:[#allocation8 + $0x1c4] sm:$0xf] }
 0x133   :  { %2357 = vmatpush.bf16.msra.mxu0 %v3535_v19  ;;  %2379 = vmatpush.bf16.msra.mxu2 %v3711_v45  ;;  %v4105_v19 = vld [vmem:[#allocation8 + $0x114] sm:$0xf]  ;;  %v3751_v8 = vor.u32 %v4127_v6, %v3748_v7  ;;  %v1969_v6 = vld [vmem:[%s4470_s4] sm:$0x3] }
 0x134   :  { %2371 = vmatpush.bf16.msra.mxu1 %v3599_v24  ;;  %v3739_v24 = vor.u32 %v4126_v16, %v3738_v23  ;;  %v3663_v2 = vor.u32 %v4105_v19, %v3660_v37  ;;  %v3732_v23 = vld [vmem:[#allocation8 + $0x1a8] sm:$0xf0]  ;;  %v4143_v7 = vld [vmem:[#allocation10 + $0x40] sm:$0xff] }
 0x136   :  { %2340 = vmatpush.bf16.msrb.mxu3 %v3747_v14 }
 0x137   :  { %2358 = vmatpush.bf16.msra.mxu0 %v3527_v29  ;;  %2380 = vmatpush.bf16.msra.mxu2 %v3703_v49  ;;  %v1723_v29 = vadd.f32 %v1722_v5, %v1709_v42  ;;  %v4120_v49 = vld [vmem:[#allocation8 + $0x184] sm:$0xf0]  ;;  %v3724_v42 = vld [vmem:[#allocation8 + $0x198] sm:$0xf0] }
 0x138   :  { %2372 = vmatpush.bf16.msra.mxu1 %v3591_v34  ;;  %v1748_v18 = vpop.f32.mrf.mxu1  ;;  %v3655_v34 = vor.u32 %v4103_v27, %v3652_v28  ;;  %v3715_v11 = vor.u32 %v4120_v49, %v3714_v48  ;;  %v3716_v27 = vld [vmem:[#allocation8 + $0x188] sm:$0xf0] }
 0x139   :  { %v1734_v63 = vpop.f32.mrf.mxu0 }
 0x13a   :  { %2359 = vmatmul.bf16.vlgmr.msra.gmra.mxu0 %v4448_v17  ;;  %v3695_v17 = vor.u32 %v4113_v52, %v3692_v53  ;;  %v1735_v31 = vadd.f32 %v1734_v63, %v1721_v20  ;;  %2341 = vmatpush.bf16.msrb.mxu3 %v3739_v24  ;;  %v3772_v52 = vld [vmem:[#allocation8 + $0x1f8] sm:$0xf0]  ;;  %v4129_v63 = vld [vmem:[#allocation8 + $0x1d4] sm:$0xf] }
 0x13b   :  { %2373 = vmatmul.bf16.vlgmr.msra.gmra.mxu1 %v1902_v26  ;;  %v4124_v26 = vld [vmem:[#allocation8 + $0x1a4] sm:$0xf0]  ;;  %v3775_v53 = vor.u32 %v4133_v51, %v3772_v52  ;;  %v3759_v4 = vor.u32 %v4129_v63, %v3756_v1  ;;  %v4121_v20 = vld [vmem:[#allocation8 + $0x194] sm:$0xf]  ;;  %v4142_v51 = vld [vmem:[#allocation10 + $0x38] sm:$0xff] }
 0x13c   :  { %2381 = vmatpush.bf16.msra.mxu2 %v3695_v17  ;;  %v3731_v33 = vor.u32 %v4124_v26, %v3730_v25  ;;  %v1749_v22 = vadd.f32 %v1748_v18, %v1735_v31  ;;  %2545 = vmatpush.bf16.msrb.mxu0 %v4142_v51  ;;  %v4141_v52 = vld [vmem:[#allocation10 + $0x30] sm:$0xff] }
 0x13d   :  { %v4145_v63 = vld [vmem:[#allocation10 + $0x50] sm:$0xff] }
 0x13e   :  { %2342 = vmatpush.bf16.msrb.mxu3 %v3731_v33 }
 0x140   :  { %2382 = vmatpush.bf16.msra.mxu2 %v3687_v61  ;;  %v1762_v21 = vpop.f32.mrf.mxu2  ;;  %v1776_v32 = vpop.f32.mrf.mxu3  ;;  %2546 = vmatpush.bf16.msrb.mxu0 %v4141_v52 }
 0x141   :  { %v1736_v41 = vpop.f32.mrf.mxu0  ;;  %v1750_v36 = vpop.f32.mrf.mxu1  ;;  %v1763_v45 = vadd.f32 %v1762_v21, %v1749_v22  ;;  %v4119_v21 = vld [vmem:[#allocation8 + $0x184] sm:$0xf] }
 0x142   :  { %v1737_v35 = vadd.f32 %v1736_v41, %v1723_v29  ;;  %2343 = vmatpush.bf16.msrb.mxu3 %v3723_v44  ;;  %v3727_v41 = vor.u32 %v4121_v20, %v3724_v42  ;;  %v3719_v30 = vor.u32 %v4119_v21, %v3716_v27 }
 0x143   :  { %v1777_v0 = vadd.f32 %v1776_v32, %v1763_v45 }
 0x144   :  { %2383 = vmatpush.bf16.msra.mxu2 %v3679_v62  ;;  %v1751_v46 = vadd.f32 %v1750_v36, %v1737_v35  ;;  %v4125_v62 = vld [vmem:[#allocation8 + $0x1b4] sm:$0xf] }
 0x145   :  { %v3743_v14 = vor.u32 %v4125_v62, %v3740_v12 }
 0x146   :  { %2344 = vmatpush.bf16.msrb.mxu3 %v3715_v11 }
 0x148   :  { %2384 = vmatpush.bf16.msra.mxu2 %v3671_v15  ;;  %v1764_v40 = vpop.f32.mrf.mxu2  ;;  %v1778_v50 = vpop.f32.mrf.mxu3  ;;  %v4123_v15 = vld [vmem:[#allocation8 + $0x1a4] sm:$0xf] }
 0x149   :  { %v1765_v47 = vadd.f32 %v1764_v40, %v1751_v46  ;;  %v3735_v16 = vor.u32 %v4123_v15, %v3732_v23 }
 0x14a   :  { %2393 = vmatpush.bf16.msra.mxu3 %v3775_v53  ;;  %v4139_v53 = vld [vmem:[#allocation10 + $0x20] sm:$0xff] }
 0x14b   :  { %v1779_v17 = vadd.f32 %v1778_v50, %v1765_v47 }
 0x14c   :  { %2385 = vmatpush.bf16.msra.mxu2 %v3663_v2 }
 0x14e   :  { %2394 = vmatpush.bf16.msra.mxu3 %v3767_v59  ;;  %v4135_v59 = vld [vmem:[#allocation10] sm:$0xff] }
 0x150   :  { %2386 = vmatpush.bf16.msra.mxu2 %v3655_v34 }
 0x152   :  { %2395 = vmatpush.bf16.msra.mxu3 %v3759_v4 }
 0x156   :  { %2396 = vmatpush.bf16.msra.mxu3 %v3751_v8  ;;  %v1971_v8 = vperm.slane %v1969_v6, 0 }
 0x158   :  { %v1804_v5 = vpop.f32.mrf.mxu1 }
 0x159   :  { %v1790_v43 = vpop.f32.mrf.mxu0  ;;  %v1805_v19 = vadd.f32 %v1804_v5, %v340_v13  ;;  %v4144_v5 = vld [vmem:[#allocation10 + $0x48] sm:$0xff] }
 0x15a   :  { %v1791_v57 = vadd.f32 %v1790_v43, %v1777_v0  ;;  %2397 = vmatpush.bf16.msra.mxu3 %v3743_v14  ;;  %v4140_v0 = vld [vmem:[#allocation10 + $0x28] sm:$0xff] }
 0x15b   :  { %2547 = vmatpush.bf16.msrb.mxu0 %v4140_v0 }
 0x15c   :  { %v1895_v60 = vmax.f32 %v1791_v57, 0.0  ;;  %v4150_v57 = vld [vmem:[#allocation10 + $0x78] sm:$0xff] }
 0x15d   :  { %2559 = vmatpush.bf16.msrb.mxu1 %v4150_v57 }
 0x15e   :  { %2398 = vmatpush.bf16.msra.mxu3 %v3735_v16 }
 0x15f   :  { %2548 = vmatpush.bf16.msrb.mxu0 %v4139_v53 }
 0x160   :  { %v1818_v9 = vpop.f32.mrf.mxu2  ;;  %v1832_v10 = vpop.f32.mrf.mxu3 }
 0x161   :  { %v1792_v54 = vpop.f32.mrf.mxu0  ;;  %v1806_v18 = vpop.f32.mrf.mxu1  ;;  %v1819_v24 = vadd.f32 %v1818_v9, %v1805_v19  ;;  %2560 = vmatpush.bf16.msrb.mxu1 %v4149_v55 }
 0x162   :  { %v1793_v58 = vadd.f32 %v1792_v54, %v1779_v17  ;;  %v1807_v2 = vadd.f32 %v1806_v18, %v340_v13  ;;  %2399 = vmatpush.bf16.msra.mxu3 %v3727_v41  ;;  %v4138_v17 = vld [vmem:[#allocation10 + $0x18] sm:$0xff]  ;;  %v4137_v54 = vld [vmem:[#allocation10 + $0x10] sm:$0xff] }
 0x163   :  { %v1833_v29 = vadd.f32 %v1832_v10, %v1819_v24  ;;  %2549 = vmatpush.bf16.msrb.mxu0 %v4138_v17 }
 0x164   :  { %v1899_v61 = vmax.f32 %v1793_v58, 0.0  ;;  %v4148_v58 = vld [vmem:[#allocation10 + $0x68] sm:$0xff] }
 0x165   :  { %2561 = vmatpush.bf16.msrb.mxu1 %v4148_v58 }
 0x166   :  { %v1903_v3 = vpack.c.bf16 %v1899_v61, %v1895_v60  ;;  %2400 = vmatpush.bf16.msra.mxu3 %v3719_v30  ;;  %v4147_v60 = vld [vmem:[#allocation10 + $0x60] sm:$0xff]  ;;  %v4146_v61 = vld [vmem:[#allocation10 + $0x58] sm:$0xff] }
 0x167   :  { %2550 = vmatpush.bf16.msrb.mxu0 %v4137_v54 }
 0x168   :  { %2331 = vmatmul.bf16.vlgmr.msrb.gmra.mxu2 %v1903_v3  ;;  %v1820_v37 = vpop.f32.mrf.mxu2  ;;  %v1834_v25 = vpop.f32.mrf.mxu3 }
 0x169   :  { %v1821_v31 = vadd.f32 %v1820_v37, %v1807_v2  ;;  %2562 = vmatpush.bf16.msrb.mxu1 %v4147_v60 }
 0x16b   :  { %v1835_v34 = vadd.f32 %v1834_v25, %v1821_v31  ;;  %2551 = vmatpush.bf16.msrb.mxu0 %v4136_v56 }
 0x16d   :  { %2563 = vmatpush.bf16.msrb.mxu1 %v4146_v61 }
 0x16f   :  { %2552 = vmatpush.bf16.msrb.mxu0 %v4135_v59 }
 0x171   :  { %2564 = vmatpush.bf16.msrb.mxu1 %v4145_v63 }
 0x175   :  { %2565 = vmatpush.bf16.msrb.mxu1 %v4144_v5 }
 0x178   :  { %2387 = vmatmul.bf16.vlgmr.msra.gmra.mxu2 %v1903_v3  ;;  %v1860_v28 = vpop.f32.mrf.mxu1 }
 0x179   :  { %v1846_v26 = vpop.f32.mrf.mxu0  ;;  %2566 = vmatpush.bf16.msrb.mxu1 %v4143_v7 }
 0x17a   :  { %v1847_v32 = vadd.f32 %v1846_v26, %v1833_v29  ;;  %v1972_v26 = vperm.slane %v1969_v6, 1 }
 0x17c   :  { %v1861_v36 = vadd.f32 %v1860_v28, %v1847_v32 }
 0x180   :  { %v1874_v33 = vpop.f32.mrf.mxu2  ;;  %v1888_v22 = vpop.f32.mrf.mxu3 }
 0x181   :  { %v1848_v35 = vpop.f32.mrf.mxu0  ;;  %v1875_v39 = vadd.f32 %v1874_v33, %v1861_v36  ;;  %v1862_v40 = vpop.f32.mrf.mxu1 }
 0x182   :  { %v1849_v38 = vadd.f32 %v1848_v35, %v1835_v34 }
 0x183   :  { %v1889_v45 = vadd.f32 %v1888_v22, %v1875_v39 }
 0x184   :  { %v1863_v43 = vadd.f32 %v1862_v40, %v1849_v38 }
 0x185   :  { %v1896_v49 = vmax.f32 %v1889_v45, 0.0 }
 0x188   :  { %v1876_v44 = vpop.f32.mrf.mxu2  ;;  %v1890_v47 = vpop.f32.mrf.mxu3 }
 0x189   :  { %v1877_v46 = vadd.f32 %v1876_v44, %v1863_v43 }
 0x18b   :  { %v1891_v48 = vadd.f32 %v1890_v47, %v1877_v46  ;;  %v4165_v46 = vld [vmem:[%s4472_s6] ss:$0 sm:$0xff] }
 0x18d   :  { %v1900_v50 = vmax.f32 %v1891_v48, 0.0 }
 0x18f   :  { %v1904_v11 = vpack.c.bf16 %v1900_v50, %v1896_v49 }
 0x191   :  { %2345 = vmatmul.bf16.vlgmr.msrb.gmra.mxu3 %v1904_v11 }
 0x197   :  { %v2304_v1 = vpop.f32.mrf.mxu0 }
 0x198   :  { %v2305_v13 = vadd.f32 %v2304_v1, %v1971_v8 }
 0x19f   :  { %v2306_v9 = vpop.f32.mrf.mxu0 }
 0x1a0   :  { %v2307_v14 = vadd.f32 %v2306_v9, %v1971_v8 }
 0x1a1   :  { %2401 = vmatmul.bf16.vlgmr.msra.gmra.mxu3 %v1904_v11 }
 0x1a7   :  { %v2318_v3 = vpop.f32.mrf.mxu1 }
 0x1a8   :  { %v2319_v15 = vadd.f32 %v2318_v3, %v2305_v13 }
 0x1af   :  { %v2320_v10 = vpop.f32.mrf.mxu1 }
 0x1b0   :  { %v2321_v23 = vadd.f32 %v2320_v10, %v2307_v14 }
 0x1b7   :  { %v2360_v18 = vpop.f32.mrf.mxu0 }
 0x1b8   :  { %v2374_v20 = vpop.f32.mrf.mxu1  ;;  %v2361_v28 = vadd.f32 %v2360_v18, %v1972_v26 }
 0x1ba   :  { %v2375_v32 = vadd.f32 %v2374_v20, %v2361_v28 }
 0x1bf   :  { %v2362_v27 = vpop.f32.mrf.mxu0 }
 0x1c0   :  { %v2376_v29 = vpop.f32.mrf.mxu1  ;;  %v2363_v31 = vadd.f32 %v2362_v27, %v1972_v26 }
 0x1c2   :  { %v2377_v34 = vadd.f32 %v2376_v29, %v2363_v31 }
 0x1eb   :  { %v2332_v4 = vpop.f32.mrf.mxu2 }
 0x1ec   :  { %v2333_v16 = vadd.f32 %v2332_v4, %v2319_v15 }
 0x1f3   :  { %v2334_v62 = vpop.f32.mrf.mxu2 }
 0x1f4   :  { %v2335_v19 = vadd.f32 %v2334_v62, %v2321_v23 }
 0x1fb   :  { %v2388_v24 = vpop.f32.mrf.mxu2 }
 0x1fc   :  { %v2389_v22 = vadd.f32 %v2388_v24, %v2375_v32 }
 0x203   :  { %v2390_v33 = vpop.f32.mrf.mxu2 }
 0x204   :  { %v2391_v35 = vadd.f32 %v2390_v33, %v2377_v34 }
 0x214   :  { %v2346_v12 = vpop.f32.mrf.mxu3 }
 0x215   :  { %v2347_v37 = vadd.f32 %v2346_v12, %v2333_v16 }
 0x217   :  { %v2407_v2 = vmax.f32 %v2347_v37, 0.0 }
 0x21c   :  { %v2348_v42 = vpop.f32.mrf.mxu3 }
 0x21d   :  { %v2349_v21 = vadd.f32 %v2348_v42, %v2335_v19 }
 0x21f   :  { %v2409_v25 = vmax.f32 %v2349_v21, 0.0 }
 0x221   :  { %v2411_v41 = vpack.c.bf16 %v2409_v25, %v2407_v2 }
 0x223   :  { %2553 = vmatmul.bf16.vlgmr.msrb.gmra.mxu0 %v2411_v41 }
 0x224   :  { %v2402_v30 = vpop.f32.mrf.mxu3 }
 0x225   :  { %v2403_v36 = vadd.f32 %v2402_v30, %v2389_v22 }
 0x227   :  { %v2408_v40 = vmax.f32 %v2403_v36, 0.0 }
 0x22c   :  { %v2404_v38 = vpop.f32.mrf.mxu3 }
 0x22d   :  { %v2405_v39 = vadd.f32 %v2404_v38, %v2391_v35 }
 0x22f   :  { %v2410_v43 = vmax.f32 %v2405_v39, 0.0 }
 0x231   :  { %v2412_v44 = vpack.c.bf16 %v2410_v43, %v2408_v40 }
 0x233   :  { %2567 = vmatmul.bf16.vlgmr.msrb.gmra.mxu1 %v2412_v44 }
 0x2a0   :  { %v2554_v45 = vpop.f32.mrf.mxu0 }
 0x2a1   :  { %v2555_v47 = vadd.f32 %v4165_v46, %v2554_v45 }
 0x2a8   :  { %v2556_v50 = vpop.f32.mrf.mxu0 }
 0x2a9   :  { %v2557_v11 = vadd.f32 %v4165_v46, %v2556_v50 }
 0x2b0   :  { %v2568_v48 = vpop.f32.mrf.mxu1 }
 0x2b1   :  { %v2569_v49 = vadd.f32 %v2568_v48, %v2555_v47 }
 0x2b3   :  { %2573 = vst [vmem:[#allocation11] sm:$0xff] %v2569_v49 }
 0x2b8   :  { %v2570_v51 = vpop.f32.mrf.mxu1 }
 0x2b9   :  { %v2571_v52 = vadd.f32 %v2570_v51, %v2557_v11 }
 0x2bb   :  { %2574 = vst [vmem:[#allocation11 + $0x8] sm:$0xff] %v2571_v52 }
 0x2bc   :  { %2587 = dma.vmem_to_hbm [thread:$0]  %s2580_s10, 256, %s2582_s1, [#allocation4], %s4322_s13, %s4322_s13, %s4323_s14  }
 0x2bd   :  { %4316 = dma.done.wait [#allocation4], 256  }
 0x2be   :  { %4317 = vsyncadd [#allocation4], 4294967040 }
 0x2bf   :  { %2592 = vsyncpa [#allocation3], 1 }
 0x2c0   :  { %2593 = vsyncpa [#allocation6], 1 }
 0x2c1   :  { %2594 = vsyncpa [#allocation9], 1 }
 0x2c2   :  { %2595 = vsyncpa [#allocation4], 1 }

</bundles_post_ra>
